<compile_context>
chip_gen: v7x
topology: tpu7x:2x2x1
jax: 0.10.0
libtpu: 0.0.40
codegen_flags: <defaults>
</compile_context>

<pallas_src>
import jax
import jax.numpy as jnp
from jax import lax
from jax.experimental import pallas as pl
from jax.experimental.pallas import tpu as pltpu


# ------------------------------ fused Encoder kernel ------------------------------
def _encoder_kernel(x_ref, wih_ref, whh_ref, bih_ref, bhh_ref,
                    fcw_ref, fcb_ref, out_ref, hid_ref):
    # x_ref   : (T*B, E)    embedded tokens, time-major, flattened
    # wih_ref : (E, 6H)     [W_ih_fwd^T | W_ih_bwd^T], gate order (r, z, n) per dir
    # whh_ref : (2H, 6H)    block-diagonal [W_hh_fwd^T ; W_hh_bwd^T]
    # bih_ref : (1, 6H), bhh_ref : (1, 6H)
    # fcw_ref : (2H, DEC), fcb_ref : (1, DEC)
    # out_ref : (T, B, 2H), hid_ref : (B, DEC)
    T = out_ref.shape[0]
    B = out_ref.shape[1]
    H = out_ref.shape[2] // 2
    H3 = 3 * H

    # ---- input projection for ALL timesteps and both directions: one MXU matmul ----
    gi_all = jnp.dot(x_ref[...], wih_ref[...],
                     preferred_element_type=jnp.float32) + bih_ref[...]   # (T*B, 6H)

    whh = whh_ref[...]                                                     # (2H, 6H)
    bhh = bhh_ref[...]                                                     # (1, 6H)

    def gru_gates(gi, gh, h_prev):
        # PyTorch GRU gate order: (r, z, n)
        r = jax.nn.sigmoid(gi[:, :H] + gh[:, :H])
        z = jax.nn.sigmoid(gi[:, H:2 * H] + gh[:, H:2 * H])
        n = jnp.tanh(gi[:, 2 * H:] + r * gh[:, 2 * H:])
        return (1.0 - z) * n + z * h_prev

    # h = [h_fwd | h_bwd], carried through a statically unrolled time loop.
    h = jnp.zeros((B, 2 * H), jnp.float32)
    for t in range(T):                     # static unroll (T is small & compile-time)
        tb = T - 1 - t                     # backward direction processes time tb
        # one fused recurrent matmul for both directions (block-diagonal whh)
        gh = jnp.dot(h, whh, preferred_element_type=jnp.float32) + bhh    # (B, 6H)
        gi_f = gi_all[t * B:(t + 1) * B, :H3]
        gi_b = gi_all[tb * B:(tb + 1) * B, H3:]
        h_f = gru_gates(gi_f, gh[:, :H3], h[:, :H])
        h_b = gru_gates(gi_b, gh[:, H3:], h[:, H:])
        out_ref[t, :, :H] = h_f
        out_ref[tb, :, H:] = h_b
        h = jnp.concatenate([h_f, h_b], axis=1)

    # ---- fused fc + tanh on the final hidden states (h_fwd_final ++ h_bwd_final) ----
    hid_ref[...] = jnp.tanh(
        jnp.dot(h, fcw_ref[...], preferred_element_type=jnp.float32) + fcb_ref[...])


def encoder_pallas(prep, src):
    """prep: prepared (fused/transposed) params; src: [T, B] int32 -> (outputs, hidden)."""
    T, B = src.shape
    E = prep["embedding"].shape[1]
    H = prep["whh"].shape[0] // 2
    DEC = prep["fc_w_t"].shape[1]

    # Embedding gather as XLA glue (tiny); dropout is eval-mode identity.
    # TODO(synk): fuse the gather into the kernel (scalar-prefetch ids + row gather)
    # and training-mode dropout via pltpu.prng_* if needed; both omitted here.
    embedded = jnp.take(prep["embedding"], src, axis=0)       # [T, B, E]
    x2d = embedded.reshape(T * B, E)                          # layout-preserving

    outputs, hidden = pl.pallas_call(
        _encoder_kernel,
        out_shape=(jax.ShapeDtypeStruct((T, B, 2 * H), jnp.float32),
                   jax.ShapeDtypeStruct((B, DEC), jnp.float32)),
        in_specs=[pl.BlockSpec(memory_space=pltpu.MemorySpace.VMEM)] * 7,
        out_specs=(pl.BlockSpec(memory_space=pltpu.MemorySpace.VMEM),
                   pl.BlockSpec(memory_space=pltpu.MemorySpace.VMEM)),
    )(x2d, prep["wih"], prep["whh"], prep["bih"], prep["bhh"],
      prep["fc_w_t"], prep["fc_b2"])
    return outputs, hidden


# ------------------------------- parameter handling -------------------------------
def init_encoder_params(key, input_dim, emb_dim, enc_hid_dim, dec_hid_dim):
    ks = jax.random.split(key, 8)
    H = enc_hid_dim
    return {
        "embedding": 0.1 * jax.random.normal(ks[0], (input_dim, emb_dim), jnp.float32),
        # GRU weights, PyTorch layout (3H, in) per direction; gate order (r, z, n)
        "w_ih": 0.1 * jax.random.normal(ks[1], (2, 3 * H, emb_dim), jnp.float32),
        "w_hh": 0.1 * jax.random.normal(ks[2], (2, 3 * H, H), jnp.float32),
        "b_ih": 0.1 * jax.random.normal(ks[3], (2, 3 * H), jnp.float32),
        "b_hh": 0.1 * jax.random.normal(ks[4], (2, 3 * H), jnp.float32),
        "fc_w": 0.1 * jax.random.normal(ks[5], (dec_hid_dim, 2 * H), jnp.float32),
        "fc_b": 0.1 * jax.random.normal(ks[6], (dec_hid_dim,), jnp.float32),
    }


def prepare_encoder_params(params):
    """One-time weight prep: transposes + direction fusion (done once, not per call)."""
    H = params["w_hh"].shape[2]
    wih = jnp.concatenate([params["w_ih"][0].T, params["w_ih"][1].T], axis=1)  # (E, 6H)
    bih = jnp.concatenate([params["b_ih"][0], params["b_ih"][1]])[None, :]     # (1, 6H)
    bhh = jnp.concatenate([params["b_hh"][0], params["b_hh"][1]])[None, :]     # (1, 6H)
    whh = jnp.zeros((2 * H, 6 * H), jnp.float32)                               # block-diag
    whh = whh.at[:H, :3 * H].set(params["w_hh"][0].T)
    whh = whh.at[H:, 3 * H:].set(params["w_hh"][1].T)
    return {
        "embedding": params["embedding"],
        "wih": wih, "whh": whh, "bih": bih, "bhh": bhh,
        "fc_w_t": params["fc_w"].T,                  # (2H, DEC)
        "fc_b2": params["fc_b"][None, :],            # (1, DEC)
    }


# --------------------------------- pure-JAX reference ---------------------------------
def _gru_cell_ref(x, h, wih_t, whh_t, bih, bhh, H):
    gi = x @ wih_t + bih
    gh = h @ whh_t + bhh
    r = jax.nn.sigmoid(gi[:, :H] + gh[:, :H])
    z = jax.nn.sigmoid(gi[:, H:2 * H] + gh[:, H:2 * H])
    n = jnp.tanh(gi[:, 2 * H:] + r * gh[:, 2 * H:])
    return (1.0 - z) * n + z * h


def encoder_ref(params, src, enc_hid_dim):
    H = enc_hid_dim
    T, B = src.shape
    emb = jnp.take(params["embedding"], src, axis=0)
    wih_t = jnp.transpose(params["w_ih"], (0, 2, 1))
    whh_t = jnp.transpose(params["w_hh"], (0, 2, 1))
    bih, bhh = params["b_ih"], params["b_hh"]

    def scan_dir(d, xs):
        def step(h, x):
            h_new = _gru_cell_ref(x, h, wih_t[d], whh_t[d], bih[d], bhh[d], H)
            return h_new, h_new
        h0 = jnp.zeros((B, H), jnp.float32)
        return lax.scan(step, h0, xs)

    h_f, out_f = scan_dir(0, emb)                       # forward over t
    h_b, out_b_rev = scan_dir(1, emb[::-1])             # backward over reversed t
    out_b = out_b_rev[::-1]
    outputs = jnp.concatenate([out_f, out_b], axis=-1)  # [T, B, 2H]
    hcat = jnp.concatenate([h_f, h_b], axis=1)
    hidden = jnp.tanh(hcat @ params["fc_w"].T + params["fc_b"])
    return outputs, hidden


# -------------------------------------- main --------------------------------------
if __name__ == "__main__":
    INPUT_DIM, EMB_DIM, ENC_HID, DEC_HID, DROPOUT = 50, 16, 32, 24, 0.1
    T, B = 8, 2

    key = jax.random.PRNGKey(0)
    k_param, k_src = jax.random.split(key)
    params = init_encoder_params(k_param, INPUT_DIM, EMB_DIM, ENC_HID, DEC_HID)
    prep = prepare_encoder_params(params)
    src = jax.random.randint(k_src, (T, B), 0, INPUT_DIM, dtype=jnp.int32)

    outputs, hidden = encoder_pallas(prep, src)
    outputs = jax.block_until_ready(outputs)
    hidden = jax.block_until_ready(hidden)

    ref_out, ref_hid = encoder_ref(params, src, ENC_HID)
    assert outputs.shape == (T, B, 2 * ENC_HID) and hidden.shape == (B, DEC_HID)
    assert jnp.allclose(outputs, ref_out, atol=1e-4, rtol=1e-4)
    assert jnp.allclose(hidden, ref_hid, atol=1e-4, rtol=1e-4)

    print("KERNEL_OK")
</pallas_src>

<mosaic_0001>
module attributes {stable_mosaic.version = 11 : i64} {
  func.func @_encoder_kernel(%arg0: memref<16x16xf32, #tpu.memory_space<vmem>>, %arg1: memref<16x192xf32, #tpu.memory_space<vmem>>, %arg2: memref<64x192xf32, #tpu.memory_space<vmem>>, %arg3: memref<1x192xf32, #tpu.memory_space<vmem>>, %arg4: memref<1x192xf32, #tpu.memory_space<vmem>>, %arg5: memref<64x24xf32, #tpu.memory_space<vmem>>, %arg6: memref<1x24xf32, #tpu.memory_space<vmem>>, %arg7: memref<8x2x64xf32, #tpu.memory_space<vmem>>, %arg8: memref<2x24xf32, #tpu.memory_space<vmem>>) attributes {dimension_semantics = [], scalar_prefetch = 0 : i64, scratch_operands = 0 : i64, tpu.core_type = #tpu.core_type<tc>} {
    %c0 = arith.constant 0 : index
    %c0_0 = arith.constant 0 : index
    %0 = vector.load %arg0[%c0, %c0_0] : memref<16x16xf32, #tpu.memory_space<vmem>>, vector<16x16xf32>
    %c0_1 = arith.constant 0 : index
    %c0_2 = arith.constant 0 : index
    %1 = vector.load %arg1[%c0_1, %c0_2] : memref<16x192xf32, #tpu.memory_space<vmem>>, vector<16x192xf32>
    %cst = arith.constant dense<0.000000e+00> : vector<16x192xf32>
    %2 = tpu.matmul %0, %1, %cst {dimension_numbers = #tpu.dot_dimension_numbers<[1], [0], [0], [1], [0, 0, 1, 1], [], []>} : vector<16x16xf32>, vector<16x192xf32>, vector<16x192xf32> -> vector<16x192xf32>
    %c0_3 = arith.constant 0 : index
    %c0_4 = arith.constant 0 : index
    %3 = vector.load %arg3[%c0_3, %c0_4] : memref<1x192xf32, #tpu.memory_space<vmem>>, vector<1x192xf32>
    %4 = vector.broadcast %3 : vector<1x192xf32> to vector<16x192xf32>
    %5 = arith.addf %2, %4 : vector<16x192xf32>
    %c0_5 = arith.constant 0 : index
    %c0_6 = arith.constant 0 : index
    %6 = vector.load %arg2[%c0_5, %c0_6] : memref<64x192xf32, #tpu.memory_space<vmem>>, vector<64x192xf32>
    %c0_7 = arith.constant 0 : index
    %c0_8 = arith.constant 0 : index
    %7 = vector.load %arg4[%c0_7, %c0_8] : memref<1x192xf32, #tpu.memory_space<vmem>>, vector<1x192xf32>
    %cst_9 = arith.constant 0.000000e+00 : f32
    %8 = vector.broadcast %cst_9 : f32 to vector<2x64xf32>
    %cst_10 = arith.constant dense<0.000000e+00> : vector<2x192xf32>
    %9 = tpu.matmul %8, %6, %cst_10 {dimension_numbers = #tpu.dot_dimension_numbers<[1], [0], [0], [1], [0, 0, 1, 1], [], []>} : vector<2x64xf32>, vector<64x192xf32>, vector<2x192xf32> -> vector<2x192xf32>
    %10 = vector.broadcast %7 : vector<1x192xf32> to vector<2x192xf32>
    %11 = arith.addf %9, %10 : vector<2x192xf32>
    %12 = vector.extract_strided_slice %5 {offsets = [0, 0], sizes = [2, 96], strides = [1, 1]} : vector<16x192xf32> to vector<2x96xf32>
    %13 = vector.extract_strided_slice %5 {offsets = [14, 96], sizes = [2, 96], strides = [1, 1]} : vector<16x192xf32> to vector<2x96xf32>
    %14 = vector.extract_strided_slice %11 {offsets = [0, 0], sizes = [2, 96], strides = [1, 1]} : vector<2x192xf32> to vector<2x96xf32>
    %15 = vector.extract_strided_slice %8 {offsets = [0, 0], sizes = [2, 32], strides = [1, 1]} : vector<2x64xf32> to vector<2x32xf32>
    %16 = vector.extract_strided_slice %12 {offsets = [0, 0], sizes = [2, 32], strides = [1, 1]} : vector<2x96xf32> to vector<2x32xf32>
    %17 = vector.extract_strided_slice %14 {offsets = [0, 0], sizes = [2, 32], strides = [1, 1]} : vector<2x96xf32> to vector<2x32xf32>
    %18 = arith.addf %16, %17 : vector<2x32xf32>
    %19 = arith.negf %18 : vector<2x32xf32>
    %20 = math.exp %19 : vector<2x32xf32>
    %cst_11 = arith.constant 1.000000e+00 : f32
    %21 = vector.broadcast %cst_11 : f32 to vector<2x32xf32>
    %22 = arith.addf %21, %20 : vector<2x32xf32>
    %23 = arith.divf %21, %22 : vector<2x32xf32>
    %24 = vector.extract_strided_slice %12 {offsets = [0, 32], sizes = [2, 32], strides = [1, 1]} : vector<2x96xf32> to vector<2x32xf32>
    %25 = vector.extract_strided_slice %14 {offsets = [0, 32], sizes = [2, 32], strides = [1, 1]} : vector<2x96xf32> to vector<2x32xf32>
    %26 = arith.addf %24, %25 : vector<2x32xf32>
    %27 = arith.negf %26 : vector<2x32xf32>
    %28 = math.exp %27 : vector<2x32xf32>
    %cst_12 = arith.constant 1.000000e+00 : f32
    %29 = vector.broadcast %cst_12 : f32 to vector<2x32xf32>
    %30 = arith.addf %29, %28 : vector<2x32xf32>
    %31 = arith.divf %29, %30 : vector<2x32xf32>
    %32 = vector.extract_strided_slice %12 {offsets = [0, 64], sizes = [2, 32], strides = [1, 1]} : vector<2x96xf32> to vector<2x32xf32>
    %33 = vector.extract_strided_slice %14 {offsets = [0, 64], sizes = [2, 32], strides = [1, 1]} : vector<2x96xf32> to vector<2x32xf32>
    %34 = arith.mulf %23, %33 : vector<2x32xf32>
    %35 = arith.addf %32, %34 : vector<2x32xf32>
    %36 = math.tanh %35 : vector<2x32xf32>
    %cst_13 = arith.constant 1.000000e+00 : f32
    %37 = vector.broadcast %cst_13 : f32 to vector<2x32xf32>
    %38 = arith.subf %37, %31 : vector<2x32xf32>
    %39 = arith.mulf %38, %36 : vector<2x32xf32>
    %40 = arith.mulf %31, %15 : vector<2x32xf32>
    %41 = arith.addf %39, %40 : vector<2x32xf32>
    %42 = vector.extract_strided_slice %11 {offsets = [0, 96], sizes = [2, 96], strides = [1, 1]} : vector<2x192xf32> to vector<2x96xf32>
    %43 = vector.extract_strided_slice %8 {offsets = [0, 32], sizes = [2, 32], strides = [1, 1]} : vector<2x64xf32> to vector<2x32xf32>
    %44 = vector.extract_strided_slice %13 {offsets = [0, 0], sizes = [2, 32], strides = [1, 1]} : vector<2x96xf32> to vector<2x32xf32>
    %45 = vector.extract_strided_slice %42 {offsets = [0, 0], sizes = [2, 32], strides = [1, 1]} : vector<2x96xf32> to vector<2x32xf32>
    %46 = arith.addf %44, %45 : vector<2x32xf32>
    %47 = arith.negf %46 : vector<2x32xf32>
    %48 = math.exp %47 : vector<2x32xf32>
    %cst_14 = arith.constant 1.000000e+00 : f32
    %49 = vector.broadcast %cst_14 : f32 to vector<2x32xf32>
    %50 = arith.addf %49, %48 : vector<2x32xf32>
    %51 = arith.divf %49, %50 : vector<2x32xf32>
    %52 = vector.extract_strided_slice %13 {offsets = [0, 32], sizes = [2, 32], strides = [1, 1]} : vector<2x96xf32> to vector<2x32xf32>
    %53 = vector.extract_strided_slice %42 {offsets = [0, 32], sizes = [2, 32], strides = [1, 1]} : vector<2x96xf32> to vector<2x32xf32>
    %54 = arith.addf %52, %53 : vector<2x32xf32>
    %55 = arith.negf %54 : vector<2x32xf32>
    %56 = math.exp %55 : vector<2x32xf32>
    %cst_15 = arith.constant 1.000000e+00 : f32
    %57 = vector.broadcast %cst_15 : f32 to vector<2x32xf32>
    %58 = arith.addf %57, %56 : vector<2x32xf32>
    %59 = arith.divf %57, %58 : vector<2x32xf32>
    %60 = vector.extract_strided_slice %13 {offsets = [0, 64], sizes = [2, 32], strides = [1, 1]} : vector<2x96xf32> to vector<2x32xf32>
    %61 = vector.extract_strided_slice %42 {offsets = [0, 64], sizes = [2, 32], strides = [1, 1]} : vector<2x96xf32> to vector<2x32xf32>
    %62 = arith.mulf %51, %61 : vector<2x32xf32>
    %63 = arith.addf %60, %62 : vector<2x32xf32>
    %64 = math.tanh %63 : vector<2x32xf32>
    %cst_16 = arith.constant 1.000000e+00 : f32
    %65 = vector.broadcast %cst_16 : f32 to vector<2x32xf32>
    %66 = arith.subf %65, %59 : vector<2x32xf32>
    %67 = arith.mulf %66, %64 : vector<2x32xf32>
    %68 = arith.mulf %59, %43 : vector<2x32xf32>
    %69 = arith.addf %67, %68 : vector<2x32xf32>
    %c0_17 = arith.constant 0 : index
    %c0_18 = arith.constant 0 : index
    %c0_19 = arith.constant 0 : index
    %70 = vector.load %arg7[%c0_17, %c0_18, %c0_19] : memref<8x2x64xf32, #tpu.memory_space<vmem>>, vector<1x2x32xf32>
    %71 = vector.shape_cast %70 : vector<1x2x32xf32> to vector<2x32xf32>
    %72 = vector.shape_cast %41 : vector<2x32xf32> to vector<1x2x32xf32>
    tpu.vector_store %arg7[%c0_17, %c0_18, %c0_19], %72 {strides = array<i32>} : memref<8x2x64xf32, #tpu.memory_space<vmem>>, vector<1x2x32xf32>,
    %c7 = arith.constant 7 : index
    %c0_20 = arith.constant 0 : index
    %c32 = arith.constant 32 : index
    %73 = vector.load %arg7[%c7, %c0_20, %c32] : memref<8x2x64xf32, #tpu.memory_space<vmem>>, vector<1x2x32xf32>
    %74 = vector.shape_cast %73 : vector<1x2x32xf32> to vector<2x32xf32>
    %75 = vector.shape_cast %69 : vector<2x32xf32> to vector<1x2x32xf32>
    tpu.vector_store %arg7[%c7, %c0_20, %c32], %75 {strides = array<i32>} : memref<8x2x64xf32, #tpu.memory_space<vmem>>, vector<1x2x32xf32>,
    %76 = tpu.concatenate %41, %69 in 1 : vector<2x32xf32>, vector<2x32xf32> -> vector<2x64xf32>
    %cst_21 = arith.constant dense<0.000000e+00> : vector<2x192xf32>
    %77 = tpu.matmul %76, %6, %cst_21 {dimension_numbers = #tpu.dot_dimension_numbers<[1], [0], [0], [1], [0, 0, 1, 1], [], []>} : vector<2x64xf32>, vector<64x192xf32>, vector<2x192xf32> -> vector<2x192xf32>
    %78 = vector.broadcast %7 : vector<1x192xf32> to vector<2x192xf32>
    %79 = arith.addf %77, %78 : vector<2x192xf32>
    %80 = vector.extract_strided_slice %5 {offsets = [2, 0], sizes = [2, 96], strides = [1, 1]} : vector<16x192xf32> to vector<2x96xf32>
    %81 = vector.extract_strided_slice %5 {offsets = [12, 96], sizes = [2, 96], strides = [1, 1]} : vector<16x192xf32> to vector<2x96xf32>
    %82 = vector.extract_strided_slice %79 {offsets = [0, 0], sizes = [2, 96], strides = [1, 1]} : vector<2x192xf32> to vector<2x96xf32>
    %83 = vector.extract_strided_slice %76 {offsets = [0, 0], sizes = [2, 32], strides = [1, 1]} : vector<2x64xf32> to vector<2x32xf32>
    %84 = vector.extract_strided_slice %80 {offsets = [0, 0], sizes = [2, 32], strides = [1, 1]} : vector<2x96xf32> to vector<2x32xf32>
    %85 = vector.extract_strided_slice %82 {offsets = [0, 0], sizes = [2, 32], strides = [1, 1]} : vector<2x96xf32> to vector<2x32xf32>
    %86 = arith.addf %84, %85 : vector<2x32xf32>
    %87 = arith.negf %86 : vector<2x32xf32>
    %88 = math.exp %87 : vector<2x32xf32>
    %cst_22 = arith.constant 1.000000e+00 : f32
    %89 = vector.broadcast %cst_22 : f32 to vector<2x32xf32>
    %90 = arith.addf %89, %88 : vector<2x32xf32>
    %91 = arith.divf %89, %90 : vector<2x32xf32>
    %92 = vector.extract_strided_slice %80 {offsets = [0, 32], sizes = [2, 32], strides = [1, 1]} : vector<2x96xf32> to vector<2x32xf32>
    %93 = vector.extract_strided_slice %82 {offsets = [0, 32], sizes = [2, 32], strides = [1, 1]} : vector<2x96xf32> to vector<2x32xf32>
    %94 = arith.addf %92, %93 : vector<2x32xf32>
    %95 = arith.negf %94 : vector<2x32xf32>
    %96 = math.exp %95 : vector<2x32xf32>
    %cst_23 = arith.constant 1.000000e+00 : f32
    %97 = vector.broadcast %cst_23 : f32 to vector<2x32xf32>
    %98 = arith.addf %97, %96 : vector<2x32xf32>
    %99 = arith.divf %97, %98 : vector<2x32xf32>
    %100 = vector.extract_strided_slice %80 {offsets = [0, 64], sizes = [2, 32], strides = [1, 1]} : vector<2x96xf32> to vector<2x32xf32>
    %101 = vector.extract_strided_slice %82 {offsets = [0, 64], sizes = [2, 32], strides = [1, 1]} : vector<2x96xf32> to vector<2x32xf32>
    %102 = arith.mulf %91, %101 : vector<2x32xf32>
    %103 = arith.addf %100, %102 : vector<2x32xf32>
    %104 = math.tanh %103 : vector<2x32xf32>
    %cst_24 = arith.constant 1.000000e+00 : f32
    %105 = vector.broadcast %cst_24 : f32 to vector<2x32xf32>
    %106 = arith.subf %105, %99 : vector<2x32xf32>
    %107 = arith.mulf %106, %104 : vector<2x32xf32>
    %108 = arith.mulf %99, %83 : vector<2x32xf32>
    %109 = arith.addf %107, %108 : vector<2x32xf32>
    %110 = vector.extract_strided_slice %79 {offsets = [0, 96], sizes = [2, 96], strides = [1, 1]} : vector<2x192xf32> to vector<2x96xf32>
    %111 = vector.extract_strided_slice %76 {offsets = [0, 32], sizes = [2, 32], strides = [1, 1]} : vector<2x64xf32> to vector<2x32xf32>
    %112 = vector.extract_strided_slice %81 {offsets = [0, 0], sizes = [2, 32], strides = [1, 1]} : vector<2x96xf32> to vector<2x32xf32>
    %113 = vector.extract_strided_slice %110 {offsets = [0, 0], sizes = [2, 32], strides = [1, 1]} : vector<2x96xf32> to vector<2x32xf32>
    %114 = arith.addf %112, %113 : vector<2x32xf32>
    %115 = arith.negf %114 : vector<2x32xf32>
    %116 = math.exp %115 : vector<2x32xf32>
    %cst_25 = arith.constant 1.000000e+00 : f32
    %117 = vector.broadcast %cst_25 : f32 to vector<2x32xf32>
    %118 = arith.addf %117, %116 : vector<2x32xf32>
    %119 = arith.divf %117, %118 : vector<2x32xf32>
    %120 = vector.extract_strided_slice %81 {offsets = [0, 32], sizes = [2, 32], strides = [1, 1]} : vector<2x96xf32> to vector<2x32xf32>
    %121 = vector.extract_strided_slice %110 {offsets = [0, 32], sizes = [2, 32], strides = [1, 1]} : vector<2x96xf32> to vector<2x32xf32>
    %122 = arith.addf %120, %121 : vector<2x32xf32>
    %123 = arith.negf %122 : vector<2x32xf32>
    %124 = math.exp %123 : vector<2x32xf32>
    %cst_26 = arith.constant 1.000000e+00 : f32
    %125 = vector.broadcast %cst_26 : f32 to vector<2x32xf32>
    %126 = arith.addf %125, %124 : vector<2x32xf32>
    %127 = arith.divf %125, %126 : vector<2x32xf32>
    %128 = vector.extract_strided_slice %81 {offsets = [0, 64], sizes = [2, 32], strides = [1, 1]} : vector<2x96xf32> to vector<2x32xf32>
    %129 = vector.extract_strided_slice %110 {offsets = [0, 64], sizes = [2, 32], strides = [1, 1]} : vector<2x96xf32> to vector<2x32xf32>
    %130 = arith.mulf %119, %129 : vector<2x32xf32>
    %131 = arith.addf %128, %130 : vector<2x32xf32>
    %132 = math.tanh %131 : vector<2x32xf32>
    %cst_27 = arith.constant 1.000000e+00 : f32
    %133 = vector.broadcast %cst_27 : f32 to vector<2x32xf32>
    %134 = arith.subf %133, %127 : vector<2x32xf32>
    %135 = arith.mulf %134, %132 : vector<2x32xf32>
    %136 = arith.mulf %127, %111 : vector<2x32xf32>
    %137 = arith.addf %135, %136 : vector<2x32xf32>
    %c1 = arith.constant 1 : index
    %c0_28 = arith.constant 0 : index
    %c0_29 = arith.constant 0 : index
    %138 = vector.load %arg7[%c1, %c0_28, %c0_29] : memref<8x2x64xf32, #tpu.memory_space<vmem>>, vector<1x2x32xf32>
    %139 = vector.shape_cast %138 : vector<1x2x32xf32> to vector<2x32xf32>
    %140 = vector.shape_cast %109 : vector<2x32xf32> to vector<1x2x32xf32>
    tpu.vector_store %arg7[%c1, %c0_28, %c0_29], %140 {strides = array<i32>} : memref<8x2x64xf32, #tpu.memory_space<vmem>>, vector<1x2x32xf32>,
    %c6 = arith.constant 6 : index
    %c0_30 = arith.constant 0 : index
    %c32_31 = arith.constant 32 : index
    %141 = vector.load %arg7[%c6, %c0_30, %c32_31] : memref<8x2x64xf32, #tpu.memory_space<vmem>>, vector<1x2x32xf32>
    %142 = vector.shape_cast %141 : vector<1x2x32xf32> to vector<2x32xf32>
    %143 = vector.shape_cast %137 : vector<2x32xf32> to vector<1x2x32xf32>
    tpu.vector_store %arg7[%c6, %c0_30, %c32_31], %143 {strides = array<i32>} : memref<8x2x64xf32, #tpu.memory_space<vmem>>, vector<1x2x32xf32>,
    %144 = tpu.concatenate %109, %137 in 1 : vector<2x32xf32>, vector<2x32xf32> -> vector<2x64xf32>
    %cst_32 = arith.constant dense<0.000000e+00> : vector<2x192xf32>
    %145 = tpu.matmul %144, %6, %cst_32 {dimension_numbers = #tpu.dot_dimension_numbers<[1], [0], [0], [1], [0, 0, 1, 1], [], []>} : vector<2x64xf32>, vector<64x192xf32>, vector<2x192xf32> -> vector<2x192xf32>
    %146 = vector.broadcast %7 : vector<1x192xf32> to vector<2x192xf32>
    %147 = arith.addf %145, %146 : vector<2x192xf32>
    %148 = vector.extract_strided_slice %5 {offsets = [4, 0], sizes = [2, 96], strides = [1, 1]} : vector<16x192xf32> to vector<2x96xf32>
    %149 = vector.extract_strided_slice %5 {offsets = [10, 96], sizes = [2, 96], strides = [1, 1]} : vector<16x192xf32> to vector<2x96xf32>
    %150 = vector.extract_strided_slice %147 {offsets = [0, 0], sizes = [2, 96], strides = [1, 1]} : vector<2x192xf32> to vector<2x96xf32>
    %151 = vector.extract_strided_slice %144 {offsets = [0, 0], sizes = [2, 32], strides = [1, 1]} : vector<2x64xf32> to vector<2x32xf32>
    %152 = vector.extract_strided_slice %148 {offsets = [0, 0], sizes = [2, 32], strides = [1, 1]} : vector<2x96xf32> to vector<2x32xf32>
    %153 = vector.extract_strided_slice %150 {offsets = [0, 0], sizes = [2, 32], strides = [1, 1]} : vector<2x96xf32> to vector<2x32xf32>
    %154 = arith.addf %152, %153 : vector<2x32xf32>
    %155 = arith.negf %154 : vector<2x32xf32>
    %156 = math.exp %155 : vector<2x32xf32>
    %cst_33 = arith.constant 1.000000e+00 : f32
    %157 = vector.broadcast %cst_33 : f32 to vector<2x32xf32>
    %158 = arith.addf %157, %156 : vector<2x32xf32>
    %159 = arith.divf %157, %158 : vector<2x32xf32>
    %160 = vector.extract_strided_slice %148 {offsets = [0, 32], sizes = [2, 32], strides = [1, 1]} : vector<2x96xf32> to vector<2x32xf32>
    %161 = vector.extract_strided_slice %150 {offsets = [0, 32], sizes = [2, 32], strides = [1, 1]} : vector<2x96xf32> to vector<2x32xf32>
    %162 = arith.addf %160, %161 : vector<2x32xf32>
    %163 = arith.negf %162 : vector<2x32xf32>
    %164 = math.exp %163 : vector<2x32xf32>
    %cst_34 = arith.constant 1.000000e+00 : f32
    %165 = vector.broadcast %cst_34 : f32 to vector<2x32xf32>
    %166 = arith.addf %165, %164 : vector<2x32xf32>
    %167 = arith.divf %165, %166 : vector<2x32xf32>
    %168 = vector.extract_strided_slice %148 {offsets = [0, 64], sizes = [2, 32], strides = [1, 1]} : vector<2x96xf32> to vector<2x32xf32>
    %169 = vector.extract_strided_slice %150 {offsets = [0, 64], sizes = [2, 32], strides = [1, 1]} : vector<2x96xf32> to vector<2x32xf32>
    %170 = arith.mulf %159, %169 : vector<2x32xf32>
    %171 = arith.addf %168, %170 : vector<2x32xf32>
    %172 = math.tanh %171 : vector<2x32xf32>
    %cst_35 = arith.constant 1.000000e+00 : f32
    %173 = vector.broadcast %cst_35 : f32 to vector<2x32xf32>
    %174 = arith.subf %173, %167 : vector<2x32xf32>
    %175 = arith.mulf %174, %172 : vector<2x32xf32>
    %176 = arith.mulf %167, %151 : vector<2x32xf32>
    %177 = arith.addf %175, %176 : vector<2x32xf32>
    %178 = vector.extract_strided_slice %147 {offsets = [0, 96], sizes = [2, 96], strides = [1, 1]} : vector<2x192xf32> to vector<2x96xf32>
    %179 = vector.extract_strided_slice %144 {offsets = [0, 32], sizes = [2, 32], strides = [1, 1]} : vector<2x64xf32> to vector<2x32xf32>
    %180 = vector.extract_strided_slice %149 {offsets = [0, 0], sizes = [2, 32], strides = [1, 1]} : vector<2x96xf32> to vector<2x32xf32>
    %181 = vector.extract_strided_slice %178 {offsets = [0, 0], sizes = [2, 32], strides = [1, 1]} : vector<2x96xf32> to vector<2x32xf32>
    %182 = arith.addf %180, %181 : vector<2x32xf32>
    %183 = arith.negf %182 : vector<2x32xf32>
    %184 = math.exp %183 : vector<2x32xf32>
    %cst_36 = arith.constant 1.000000e+00 : f32
    %185 = vector.broadcast %cst_36 : f32 to vector<2x32xf32>
    %186 = arith.addf %185, %184 : vector<2x32xf32>
    %187 = arith.divf %185, %186 : vector<2x32xf32>
    %188 = vector.extract_strided_slice %149 {offsets = [0, 32], sizes = [2, 32], strides = [1, 1]} : vector<2x96xf32> to vector<2x32xf32>
    %189 = vector.extract_strided_slice %178 {offsets = [0, 32], sizes = [2, 32], strides = [1, 1]} : vector<2x96xf32> to vector<2x32xf32>
    %190 = arith.addf %188, %189 : vector<2x32xf32>
    %191 = arith.negf %190 : vector<2x32xf32>
    %192 = math.exp %191 : vector<2x32xf32>
    %cst_37 = arith.constant 1.000000e+00 : f32
    %193 = vector.broadcast %cst_37 : f32 to vector<2x32xf32>
    %194 = arith.addf %193, %192 : vector<2x32xf32>
    %195 = arith.divf %193, %194 : vector<2x32xf32>
    %196 = vector.extract_strided_slice %149 {offsets = [0, 64], sizes = [2, 32], strides = [1, 1]} : vector<2x96xf32> to vector<2x32xf32>
    %197 = vector.extract_strided_slice %178 {offsets = [0, 64], sizes = [2, 32], strides = [1, 1]} : vector<2x96xf32> to vector<2x32xf32>
    %198 = arith.mulf %187, %197 : vector<2x32xf32>
    %199 = arith.addf %196, %198 : vector<2x32xf32>
    %200 = math.tanh %199 : vector<2x32xf32>
    %cst_38 = arith.constant 1.000000e+00 : f32
    %201 = vector.broadcast %cst_38 : f32 to vector<2x32xf32>
    %202 = arith.subf %201, %195 : vector<2x32xf32>
    %203 = arith.mulf %202, %200 : vector<2x32xf32>
    %204 = arith.mulf %195, %179 : vector<2x32xf32>
    %205 = arith.addf %203, %204 : vector<2x32xf32>
    %c2 = arith.constant 2 : index
    %c0_39 = arith.constant 0 : index
    %c0_40 = arith.constant 0 : index
    %206 = vector.load %arg7[%c2, %c0_39, %c0_40] : memref<8x2x64xf32, #tpu.memory_space<vmem>>, vector<1x2x32xf32>
    %207 = vector.shape_cast %206 : vector<1x2x32xf32> to vector<2x32xf32>
    %208 = vector.shape_cast %177 : vector<2x32xf32> to vector<1x2x32xf32>
    tpu.vector_store %arg7[%c2, %c0_39, %c0_40], %208 {strides = array<i32>} : memref<8x2x64xf32, #tpu.memory_space<vmem>>, vector<1x2x32xf32>,
    %c5 = arith.constant 5 : index
    %c0_41 = arith.constant 0 : index
    %c32_42 = arith.constant 32 : index
    %209 = vector.load %arg7[%c5, %c0_41, %c32_42] : memref<8x2x64xf32, #tpu.memory_space<vmem>>, vector<1x2x32xf32>
    %210 = vector.shape_cast %209 : vector<1x2x32xf32> to vector<2x32xf32>
    %211 = vector.shape_cast %205 : vector<2x32xf32> to vector<1x2x32xf32>
    tpu.vector_store %arg7[%c5, %c0_41, %c32_42], %211 {strides = array<i32>} : memref<8x2x64xf32, #tpu.memory_space<vmem>>, vector<1x2x32xf32>,
    %212 = tpu.concatenate %177, %205 in 1 : vector<2x32xf32>, vector<2x32xf32> -> vector<2x64xf32>
    %cst_43 = arith.constant dense<0.000000e+00> : vector<2x192xf32>
    %213 = tpu.matmul %212, %6, %cst_43 {dimension_numbers = #tpu.dot_dimension_numbers<[1], [0], [0], [1], [0, 0, 1, 1], [], []>} : vector<2x64xf32>, vector<64x192xf32>, vector<2x192xf32> -> vector<2x192xf32>
    %214 = vector.broadcast %7 : vector<1x192xf32> to vector<2x192xf32>
    %215 = arith.addf %213, %214 : vector<2x192xf32>
    %216 = vector.extract_strided_slice %5 {offsets = [6, 0], sizes = [2, 96], strides = [1, 1]} : vector<16x192xf32> to vector<2x96xf32>
    %217 = vector.extract_strided_slice %5 {offsets = [8, 96], sizes = [2, 96], strides = [1, 1]} : vector<16x192xf32> to vector<2x96xf32>
    %218 = vector.extract_strided_slice %215 {offsets = [0, 0], sizes = [2, 96], strides = [1, 1]} : vector<2x192xf32> to vector<2x96xf32>
    %219 = vector.extract_strided_slice %212 {offsets = [0, 0], sizes = [2, 32], strides = [1, 1]} : vector<2x64xf32> to vector<2x32xf32>
    %220 = vector.extract_strided_slice %216 {offsets = [0, 0], sizes = [2, 32], strides = [1, 1]} : vector<2x96xf32> to vector<2x32xf32>
    %221 = vector.extract_strided_slice %218 {offsets = [0, 0], sizes = [2, 32], strides = [1, 1]} : vector<2x96xf32> to vector<2x32xf32>
    %222 = arith.addf %220, %221 : vector<2x32xf32>
    %223 = arith.negf %222 : vector<2x32xf32>
    %224 = math.exp %223 : vector<2x32xf32>
    %cst_44 = arith.constant 1.000000e+00 : f32
    %225 = vector.broadcast %cst_44 : f32 to vector<2x32xf32>
    %226 = arith.addf %225, %224 : vector<2x32xf32>
    %227 = arith.divf %225, %226 : vector<2x32xf32>
    %228 = vector.extract_strided_slice %216 {offsets = [0, 32], sizes = [2, 32], strides = [1, 1]} : vector<2x96xf32> to vector<2x32xf32>
    %229 = vector.extract_strided_slice %218 {offsets = [0, 32], sizes = [2, 32], strides = [1, 1]} : vector<2x96xf32> to vector<2x32xf32>
    %230 = arith.addf %228, %229 : vector<2x32xf32>
    %231 = arith.negf %230 : vector<2x32xf32>
    %232 = math.exp %231 : vector<2x32xf32>
    %cst_45 = arith.constant 1.000000e+00 : f32
    %233 = vector.broadcast %cst_45 : f32 to vector<2x32xf32>
    %234 = arith.addf %233, %232 : vector<2x32xf32>
    %235 = arith.divf %233, %234 : vector<2x32xf32>
    %236 = vector.extract_strided_slice %216 {offsets = [0, 64], sizes = [2, 32], strides = [1, 1]} : vector<2x96xf32> to vector<2x32xf32>
    %237 = vector.extract_strided_slice %218 {offsets = [0, 64], sizes = [2, 32], strides = [1, 1]} : vector<2x96xf32> to vector<2x32xf32>
    %238 = arith.mulf %227, %237 : vector<2x32xf32>
    %239 = arith.addf %236, %238 : vector<2x32xf32>
    %240 = math.tanh %239 : vector<2x32xf32>
    %cst_46 = arith.constant 1.000000e+00 : f32
    %241 = vector.broadcast %cst_46 : f32 to vector<2x32xf32>
    %242 = arith.subf %241, %235 : vector<2x32xf32>
    %243 = arith.mulf %242, %240 : vector<2x32xf32>
    %244 = arith.mulf %235, %219 : vector<2x32xf32>
    %245 = arith.addf %243, %244 : vector<2x32xf32>
    %246 = vector.extract_strided_slice %215 {offsets = [0, 96], sizes = [2, 96], strides = [1, 1]} : vector<2x192xf32> to vector<2x96xf32>
    %247 = vector.extract_strided_slice %212 {offsets = [0, 32], sizes = [2, 32], strides = [1, 1]} : vector<2x64xf32> to vector<2x32xf32>
    %248 = vector.extract_strided_slice %217 {offsets = [0, 0], sizes = [2, 32], strides = [1, 1]} : vector<2x96xf32> to vector<2x32xf32>
    %249 = vector.extract_strided_slice %246 {offsets = [0, 0], sizes = [2, 32], strides = [1, 1]} : vector<2x96xf32> to vector<2x32xf32>
    %250 = arith.addf %248, %249 : vector<2x32xf32>
    %251 = arith.negf %250 : vector<2x32xf32>
    %252 = math.exp %251 : vector<2x32xf32>
    %cst_47 = arith.constant 1.000000e+00 : f32
    %253 = vector.broadcast %cst_47 : f32 to vector<2x32xf32>
    %254 = arith.addf %253, %252 : vector<2x32xf32>
    %255 = arith.divf %253, %254 : vector<2x32xf32>
    %256 = vector.extract_strided_slice %217 {offsets = [0, 32], sizes = [2, 32], strides = [1, 1]} : vector<2x96xf32> to vector<2x32xf32>
    %257 = vector.extract_strided_slice %246 {offsets = [0, 32], sizes = [2, 32], strides = [1, 1]} : vector<2x96xf32> to vector<2x32xf32>
    %258 = arith.addf %256, %257 : vector<2x32xf32>
    %259 = arith.negf %258 : vector<2x32xf32>
    %260 = math.exp %259 : vector<2x32xf32>
    %cst_48 = arith.constant 1.000000e+00 : f32
    %261 = vector.broadcast %cst_48 : f32 to vector<2x32xf32>
    %262 = arith.addf %261, %260 : vector<2x32xf32>
    %263 = arith.divf %261, %262 : vector<2x32xf32>
    %264 = vector.extract_strided_slice %217 {offsets = [0, 64], sizes = [2, 32], strides = [1, 1]} : vector<2x96xf32> to vector<2x32xf32>
    %265 = vector.extract_strided_slice %246 {offsets = [0, 64], sizes = [2, 32], strides = [1, 1]} : vector<2x96xf32> to vector<2x32xf32>
    %266 = arith.mulf %255, %265 : vector<2x32xf32>
    %267 = arith.addf %264, %266 : vector<2x32xf32>
    %268 = math.tanh %267 : vector<2x32xf32>
    %cst_49 = arith.constant 1.000000e+00 : f32
    %269 = vector.broadcast %cst_49 : f32 to vector<2x32xf32>
    %270 = arith.subf %269, %263 : vector<2x32xf32>
    %271 = arith.mulf %270, %268 : vector<2x32xf32>
    %272 = arith.mulf %263, %247 : vector<2x32xf32>
    %273 = arith.addf %271, %272 : vector<2x32xf32>
    %c3 = arith.constant 3 : index
    %c0_50 = arith.constant 0 : index
    %c0_51 = arith.constant 0 : index
    %274 = vector.load %arg7[%c3, %c0_50, %c0_51] : memref<8x2x64xf32, #tpu.memory_space<vmem>>, vector<1x2x32xf32>
    %275 = vector.shape_cast %274 : vector<1x2x32xf32> to vector<2x32xf32>
    %276 = vector.shape_cast %245 : vector<2x32xf32> to vector<1x2x32xf32>
    tpu.vector_store %arg7[%c3, %c0_50, %c0_51], %276 {strides = array<i32>} : memref<8x2x64xf32, #tpu.memory_space<vmem>>, vector<1x2x32xf32>,
    %c4 = arith.constant 4 : index
    %c0_52 = arith.constant 0 : index
    %c32_53 = arith.constant 32 : index
    %277 = vector.load %arg7[%c4, %c0_52, %c32_53] : memref<8x2x64xf32, #tpu.memory_space<vmem>>, vector<1x2x32xf32>
    %278 = vector.shape_cast %277 : vector<1x2x32xf32> to vector<2x32xf32>
    %279 = vector.shape_cast %273 : vector<2x32xf32> to vector<1x2x32xf32>
    tpu.vector_store %arg7[%c4, %c0_52, %c32_53], %279 {strides = array<i32>} : memref<8x2x64xf32, #tpu.memory_space<vmem>>, vector<1x2x32xf32>,
    %280 = tpu.concatenate %245, %273 in 1 : vector<2x32xf32>, vector<2x32xf32> -> vector<2x64xf32>
    %cst_54 = arith.constant dense<0.000000e+00> : vector<2x192xf32>
    %281 = tpu.matmul %280, %6, %cst_54 {dimension_numbers = #tpu.dot_dimension_numbers<[1], [0], [0], [1], [0, 0, 1, 1], [], []>} : vector<2x64xf32>, vector<64x192xf32>, vector<2x192xf32> -> vector<2x192xf32>
    %282 = vector.broadcast %7 : vector<1x192xf32> to vector<2x192xf32>
    %283 = arith.addf %281, %282 : vector<2x192xf32>
    %284 = vector.extract_strided_slice %5 {offsets = [8, 0], sizes = [2, 96], strides = [1, 1]} : vector<16x192xf32> to vector<2x96xf32>
    %285 = vector.extract_strided_slice %5 {offsets = [6, 96], sizes = [2, 96], strides = [1, 1]} : vector<16x192xf32> to vector<2x96xf32>
    %286 = vector.extract_strided_slice %283 {offsets = [0, 0], sizes = [2, 96], strides = [1, 1]} : vector<2x192xf32> to vector<2x96xf32>
    %287 = vector.extract_strided_slice %280 {offsets = [0, 0], sizes = [2, 32], strides = [1, 1]} : vector<2x64xf32> to vector<2x32xf32>
    %288 = vector.extract_strided_slice %284 {offsets = [0, 0], sizes = [2, 32], strides = [1, 1]} : vector<2x96xf32> to vector<2x32xf32>
    %289 = vector.extract_strided_slice %286 {offsets = [0, 0], sizes = [2, 32], strides = [1, 1]} : vector<2x96xf32> to vector<2x32xf32>
    %290 = arith.addf %288, %289 : vector<2x32xf32>
    %291 = arith.negf %290 : vector<2x32xf32>
    %292 = math.exp %291 : vector<2x32xf32>
    %cst_55 = arith.constant 1.000000e+00 : f32
    %293 = vector.broadcast %cst_55 : f32 to vector<2x32xf32>
    %294 = arith.addf %293, %292 : vector<2x32xf32>
    %295 = arith.divf %293, %294 : vector<2x32xf32>
    %296 = vector.extract_strided_slice %284 {offsets = [0, 32], sizes = [2, 32], strides = [1, 1]} : vector<2x96xf32> to vector<2x32xf32>
    %297 = vector.extract_strided_slice %286 {offsets = [0, 32], sizes = [2, 32], strides = [1, 1]} : vector<2x96xf32> to vector<2x32xf32>
    %298 = arith.addf %296, %297 : vector<2x32xf32>
    %299 = arith.negf %298 : vector<2x32xf32>
    %300 = math.exp %299 : vector<2x32xf32>
    %cst_56 = arith.constant 1.000000e+00 : f32
    %301 = vector.broadcast %cst_56 : f32 to vector<2x32xf32>
    %302 = arith.addf %301, %300 : vector<2x32xf32>
    %303 = arith.divf %301, %302 : vector<2x32xf32>
    %304 = vector.extract_strided_slice %284 {offsets = [0, 64], sizes = [2, 32], strides = [1, 1]} : vector<2x96xf32> to vector<2x32xf32>
    %305 = vector.extract_strided_slice %286 {offsets = [0, 64], sizes = [2, 32], strides = [1, 1]} : vector<2x96xf32> to vector<2x32xf32>
    %306 = arith.mulf %295, %305 : vector<2x32xf32>
    %307 = arith.addf %304, %306 : vector<2x32xf32>
    %308 = math.tanh %307 : vector<2x32xf32>
    %cst_57 = arith.constant 1.000000e+00 : f32
    %309 = vector.broadcast %cst_57 : f32 to vector<2x32xf32>
    %310 = arith.subf %309, %303 : vector<2x32xf32>
    %311 = arith.mulf %310, %308 : vector<2x32xf32>
    %312 = arith.mulf %303, %287 : vector<2x32xf32>
    %313 = arith.addf %311, %312 : vector<2x32xf32>
    %314 = vector.extract_strided_slice %283 {offsets = [0, 96], sizes = [2, 96], strides = [1, 1]} : vector<2x192xf32> to vector<2x96xf32>
    %315 = vector.extract_strided_slice %280 {offsets = [0, 32], sizes = [2, 32], strides = [1, 1]} : vector<2x64xf32> to vector<2x32xf32>
    %316 = vector.extract_strided_slice %285 {offsets = [0, 0], sizes = [2, 32], strides = [1, 1]} : vector<2x96xf32> to vector<2x32xf32>
    %317 = vector.extract_strided_slice %314 {offsets = [0, 0], sizes = [2, 32], strides = [1, 1]} : vector<2x96xf32> to vector<2x32xf32>
    %318 = arith.addf %316, %317 : vector<2x32xf32>
    %319 = arith.negf %318 : vector<2x32xf32>
    %320 = math.exp %319 : vector<2x32xf32>
    %cst_58 = arith.constant 1.000000e+00 : f32
    %321 = vector.broadcast %cst_58 : f32 to vector<2x32xf32>
    %322 = arith.addf %321, %320 : vector<2x32xf32>
    %323 = arith.divf %321, %322 : vector<2x32xf32>
    %324 = vector.extract_strided_slice %285 {offsets = [0, 32], sizes = [2, 32], strides = [1, 1]} : vector<2x96xf32> to vector<2x32xf32>
    %325 = vector.extract_strided_slice %314 {offsets = [0, 32], sizes = [2, 32], strides = [1, 1]} : vector<2x96xf32> to vector<2x32xf32>
    %326 = arith.addf %324, %325 : vector<2x32xf32>
    %327 = arith.negf %326 : vector<2x32xf32>
    %328 = math.exp %327 : vector<2x32xf32>
    %cst_59 = arith.constant 1.000000e+00 : f32
    %329 = vector.broadcast %cst_59 : f32 to vector<2x32xf32>
    %330 = arith.addf %329, %328 : vector<2x32xf32>
    %331 = arith.divf %329, %330 : vector<2x32xf32>
    %332 = vector.extract_strided_slice %285 {offsets = [0, 64], sizes = [2, 32], strides = [1, 1]} : vector<2x96xf32> to vector<2x32xf32>
    %333 = vector.extract_strided_slice %314 {offsets = [0, 64], sizes = [2, 32], strides = [1, 1]} : vector<2x96xf32> to vector<2x32xf32>
    %334 = arith.mulf %323, %333 : vector<2x32xf32>
    %335 = arith.addf %332, %334 : vector<2x32xf32>
    %336 = math.tanh %335 : vector<2x32xf32>
    %cst_60 = arith.constant 1.000000e+00 : f32
    %337 = vector.broadcast %cst_60 : f32 to vector<2x32xf32>
    %338 = arith.subf %337, %331 : vector<2x32xf32>
    %339 = arith.mulf %338, %336 : vector<2x32xf32>
    %340 = arith.mulf %331, %315 : vector<2x32xf32>
    %341 = arith.addf %339, %340 : vector<2x32xf32>
    %c4_61 = arith.constant 4 : index
    %c0_62 = arith.constant 0 : index
    %c0_63 = arith.constant 0 : index
    %342 = vector.load %arg7[%c4_61, %c0_62, %c0_63] : memref<8x2x64xf32, #tpu.memory_space<vmem>>, vector<1x2x32xf32>
    %343 = vector.shape_cast %342 : vector<1x2x32xf32> to vector<2x32xf32>
    %344 = vector.shape_cast %313 : vector<2x32xf32> to vector<1x2x32xf32>
    tpu.vector_store %arg7[%c4_61, %c0_62, %c0_63], %344 {strides = array<i32>} : memref<8x2x64xf32, #tpu.memory_space<vmem>>, vector<1x2x32xf32>,
    %c3_64 = arith.constant 3 : index
    %c0_65 = arith.constant 0 : index
    %c32_66 = arith.constant 32 : index
    %345 = vector.load %arg7[%c3_64, %c0_65, %c32_66] : memref<8x2x64xf32, #tpu.memory_space<vmem>>, vector<1x2x32xf32>
    %346 = vector.shape_cast %345 : vector<1x2x32xf32> to vector<2x32xf32>
    %347 = vector.shape_cast %341 : vector<2x32xf32> to vector<1x2x32xf32>
    tpu.vector_store %arg7[%c3_64, %c0_65, %c32_66], %347 {strides = array<i32>} : memref<8x2x64xf32, #tpu.memory_space<vmem>>, vector<1x2x32xf32>,
    %348 = tpu.concatenate %313, %341 in 1 : vector<2x32xf32>, vector<2x32xf32> -> vector<2x64xf32>
    %cst_67 = arith.constant dense<0.000000e+00> : vector<2x192xf32>
    %349 = tpu.matmul %348, %6, %cst_67 {dimension_numbers = #tpu.dot_dimension_numbers<[1], [0], [0], [1], [0, 0, 1, 1], [], []>} : vector<2x64xf32>, vector<64x192xf32>, vector<2x192xf32> -> vector<2x192xf32>
    %350 = vector.broadcast %7 : vector<1x192xf32> to vector<2x192xf32>
    %351 = arith.addf %349, %350 : vector<2x192xf32>
    %352 = vector.extract_strided_slice %5 {offsets = [10, 0], sizes = [2, 96], strides = [1, 1]} : vector<16x192xf32> to vector<2x96xf32>
    %353 = vector.extract_strided_slice %5 {offsets = [4, 96], sizes = [2, 96], strides = [1, 1]} : vector<16x192xf32> to vector<2x96xf32>
    %354 = vector.extract_strided_slice %351 {offsets = [0, 0], sizes = [2, 96], strides = [1, 1]} : vector<2x192xf32> to vector<2x96xf32>
    %355 = vector.extract_strided_slice %348 {offsets = [0, 0], sizes = [2, 32], strides = [1, 1]} : vector<2x64xf32> to vector<2x32xf32>
    %356 = vector.extract_strided_slice %352 {offsets = [0, 0], sizes = [2, 32], strides = [1, 1]} : vector<2x96xf32> to vector<2x32xf32>
    %357 = vector.extract_strided_slice %354 {offsets = [0, 0], sizes = [2, 32], strides = [1, 1]} : vector<2x96xf32> to vector<2x32xf32>
    %358 = arith.addf %356, %357 : vector<2x32xf32>
    %359 = arith.negf %358 : vector<2x32xf32>
    %360 = math.exp %359 : vector<2x32xf32>
    %cst_68 = arith.constant 1.000000e+00 : f32
    %361 = vector.broadcast %cst_68 : f32 to vector<2x32xf32>
    %362 = arith.addf %361, %360 : vector<2x32xf32>
    %363 = arith.divf %361, %362 : vector<2x32xf32>
    %364 = vector.extract_strided_slice %352 {offsets = [0, 32], sizes = [2, 32], strides = [1, 1]} : vector<2x96xf32> to vector<2x32xf32>
    %365 = vector.extract_strided_slice %354 {offsets = [0, 32], sizes = [2, 32], strides = [1, 1]} : vector<2x96xf32> to vector<2x32xf32>
    %366 = arith.addf %364, %365 : vector<2x32xf32>
    %367 = arith.negf %366 : vector<2x32xf32>
    %368 = math.exp %367 : vector<2x32xf32>
    %cst_69 = arith.constant 1.000000e+00 : f32
    %369 = vector.broadcast %cst_69 : f32 to vector<2x32xf32>
    %370 = arith.addf %369, %368 : vector<2x32xf32>
    %371 = arith.divf %369, %370 : vector<2x32xf32>
    %372 = vector.extract_strided_slice %352 {offsets = [0, 64], sizes = [2, 32], strides = [1, 1]} : vector<2x96xf32> to vector<2x32xf32>
    %373 = vector.extract_strided_slice %354 {offsets = [0, 64], sizes = [2, 32], strides = [1, 1]} : vector<2x96xf32> to vector<2x32xf32>
    %374 = arith.mulf %363, %373 : vector<2x32xf32>
    %375 = arith.addf %372, %374 : vector<2x32xf32>
    %376 = math.tanh %375 : vector<2x32xf32>
    %cst_70 = arith.constant 1.000000e+00 : f32
    %377 = vector.broadcast %cst_70 : f32 to vector<2x32xf32>
    %378 = arith.subf %377, %371 : vector<2x32xf32>
    %379 = arith.mulf %378, %376 : vector<2x32xf32>
    %380 = arith.mulf %371, %355 : vector<2x32xf32>
    %381 = arith.addf %379, %380 : vector<2x32xf32>
    %382 = vector.extract_strided_slice %351 {offsets = [0, 96], sizes = [2, 96], strides = [1, 1]} : vector<2x192xf32> to vector<2x96xf32>
    %383 = vector.extract_strided_slice %348 {offsets = [0, 32], sizes = [2, 32], strides = [1, 1]} : vector<2x64xf32> to vector<2x32xf32>
    %384 = vector.extract_strided_slice %353 {offsets = [0, 0], sizes = [2, 32], strides = [1, 1]} : vector<2x96xf32> to vector<2x32xf32>
    %385 = vector.extract_strided_slice %382 {offsets = [0, 0], sizes = [2, 32], strides = [1, 1]} : vector<2x96xf32> to vector<2x32xf32>
    %386 = arith.addf %384, %385 : vector<2x32xf32>
    %387 = arith.negf %386 : vector<2x32xf32>
    %388 = math.exp %387 : vector<2x32xf32>
    %cst_71 = arith.constant 1.000000e+00 : f32
    %389 = vector.broadcast %cst_71 : f32 to vector<2x32xf32>
    %390 = arith.addf %389, %388 : vector<2x32xf32>
    %391 = arith.divf %389, %390 : vector<2x32xf32>
    %392 = vector.extract_strided_slice %353 {offsets = [0, 32], sizes = [2, 32], strides = [1, 1]} : vector<2x96xf32> to vector<2x32xf32>
    %393 = vector.extract_strided_slice %382 {offsets = [0, 32], sizes = [2, 32], strides = [1, 1]} : vector<2x96xf32> to vector<2x32xf32>
    %394 = arith.addf %392, %393 : vector<2x32xf32>
    %395 = arith.negf %394 : vector<2x32xf32>
    %396 = math.exp %395 : vector<2x32xf32>
    %cst_72 = arith.constant 1.000000e+00 : f32
    %397 = vector.broadcast %cst_72 : f32 to vector<2x32xf32>
    %398 = arith.addf %397, %396 : vector<2x32xf32>
    %399 = arith.divf %397, %398 : vector<2x32xf32>
    %400 = vector.extract_strided_slice %353 {offsets = [0, 64], sizes = [2, 32], strides = [1, 1]} : vector<2x96xf32> to vector<2x32xf32>
    %401 = vector.extract_strided_slice %382 {offsets = [0, 64], sizes = [2, 32], strides = [1, 1]} : vector<2x96xf32> to vector<2x32xf32>
    %402 = arith.mulf %391, %401 : vector<2x32xf32>
    %403 = arith.addf %400, %402 : vector<2x32xf32>
    %404 = math.tanh %403 : vector<2x32xf32>
    %cst_73 = arith.constant 1.000000e+00 : f32
    %405 = vector.broadcast %cst_73 : f32 to vector<2x32xf32>
    %406 = arith.subf %405, %399 : vector<2x32xf32>
    %407 = arith.mulf %406, %404 : vector<2x32xf32>
    %408 = arith.mulf %399, %383 : vector<2x32xf32>
    %409 = arith.addf %407, %408 : vector<2x32xf32>
    %c5_74 = arith.constant 5 : index
    %c0_75 = arith.constant 0 : index
    %c0_76 = arith.constant 0 : index
    %410 = vector.load %arg7[%c5_74, %c0_75, %c0_76] : memref<8x2x64xf32, #tpu.memory_space<vmem>>, vector<1x2x32xf32>
    %411 = vector.shape_cast %410 : vector<1x2x32xf32> to vector<2x32xf32>
    %412 = vector.shape_cast %381 : vector<2x32xf32> to vector<1x2x32xf32>
    tpu.vector_store %arg7[%c5_74, %c0_75, %c0_76], %412 {strides = array<i32>} : memref<8x2x64xf32, #tpu.memory_space<vmem>>, vector<1x2x32xf32>,
    %c2_77 = arith.constant 2 : index
    %c0_78 = arith.constant 0 : index
    %c32_79 = arith.constant 32 : index
    %413 = vector.load %arg7[%c2_77, %c0_78, %c32_79] : memref<8x2x64xf32, #tpu.memory_space<vmem>>, vector<1x2x32xf32>
    %414 = vector.shape_cast %413 : vector<1x2x32xf32> to vector<2x32xf32>
    %415 = vector.shape_cast %409 : vector<2x32xf32> to vector<1x2x32xf32>
    tpu.vector_store %arg7[%c2_77, %c0_78, %c32_79], %415 {strides = array<i32>} : memref<8x2x64xf32, #tpu.memory_space<vmem>>, vector<1x2x32xf32>,
    %416 = tpu.concatenate %381, %409 in 1 : vector<2x32xf32>, vector<2x32xf32> -> vector<2x64xf32>
    %cst_80 = arith.constant dense<0.000000e+00> : vector<2x192xf32>
    %417 = tpu.matmul %416, %6, %cst_80 {dimension_numbers = #tpu.dot_dimension_numbers<[1], [0], [0], [1], [0, 0, 1, 1], [], []>} : vector<2x64xf32>, vector<64x192xf32>, vector<2x192xf32> -> vector<2x192xf32>
    %418 = vector.broadcast %7 : vector<1x192xf32> to vector<2x192xf32>
    %419 = arith.addf %417, %418 : vector<2x192xf32>
    %420 = vector.extract_strided_slice %5 {offsets = [12, 0], sizes = [2, 96], strides = [1, 1]} : vector<16x192xf32> to vector<2x96xf32>
    %421 = vector.extract_strided_slice %5 {offsets = [2, 96], sizes = [2, 96], strides = [1, 1]} : vector<16x192xf32> to vector<2x96xf32>
    %422 = vector.extract_strided_slice %419 {offsets = [0, 0], sizes = [2, 96], strides = [1, 1]} : vector<2x192xf32> to vector<2x96xf32>
    %423 = vector.extract_strided_slice %416 {offsets = [0, 0], sizes = [2, 32], strides = [1, 1]} : vector<2x64xf32> to vector<2x32xf32>
    %424 = vector.extract_strided_slice %420 {offsets = [0, 0], sizes = [2, 32], strides = [1, 1]} : vector<2x96xf32> to vector<2x32xf32>
    %425 = vector.extract_strided_slice %422 {offsets = [0, 0], sizes = [2, 32], strides = [1, 1]} : vector<2x96xf32> to vector<2x32xf32>
    %426 = arith.addf %424, %425 : vector<2x32xf32>
    %427 = arith.negf %426 : vector<2x32xf32>
    %428 = math.exp %427 : vector<2x32xf32>
    %cst_81 = arith.constant 1.000000e+00 : f32
    %429 = vector.broadcast %cst_81 : f32 to vector<2x32xf32>
    %430 = arith.addf %429, %428 : vector<2x32xf32>
    %431 = arith.divf %429, %430 : vector<2x32xf32>
    %432 = vector.extract_strided_slice %420 {offsets = [0, 32], sizes = [2, 32], strides = [1, 1]} : vector<2x96xf32> to vector<2x32xf32>
    %433 = vector.extract_strided_slice %422 {offsets = [0, 32], sizes = [2, 32], strides = [1, 1]} : vector<2x96xf32> to vector<2x32xf32>
    %434 = arith.addf %432, %433 : vector<2x32xf32>
    %435 = arith.negf %434 : vector<2x32xf32>
    %436 = math.exp %435 : vector<2x32xf32>
    %cst_82 = arith.constant 1.000000e+00 : f32
    %437 = vector.broadcast %cst_82 : f32 to vector<2x32xf32>
    %438 = arith.addf %437, %436 : vector<2x32xf32>
    %439 = arith.divf %437, %438 : vector<2x32xf32>
    %440 = vector.extract_strided_slice %420 {offsets = [0, 64], sizes = [2, 32], strides = [1, 1]} : vector<2x96xf32> to vector<2x32xf32>
    %441 = vector.extract_strided_slice %422 {offsets = [0, 64], sizes = [2, 32], strides = [1, 1]} : vector<2x96xf32> to vector<2x32xf32>
    %442 = arith.mulf %431, %441 : vector<2x32xf32>
    %443 = arith.addf %440, %442 : vector<2x32xf32>
    %444 = math.tanh %443 : vector<2x32xf32>
    %cst_83 = arith.constant 1.000000e+00 : f32
    %445 = vector.broadcast %cst_83 : f32 to vector<2x32xf32>
    %446 = arith.subf %445, %439 : vector<2x32xf32>
    %447 = arith.mulf %446, %444 : vector<2x32xf32>
    %448 = arith.mulf %439, %423 : vector<2x32xf32>
    %449 = arith.addf %447, %448 : vector<2x32xf32>
    %450 = vector.extract_strided_slice %419 {offsets = [0, 96], sizes = [2, 96], strides = [1, 1]} : vector<2x192xf32> to vector<2x96xf32>
    %451 = vector.extract_strided_slice %416 {offsets = [0, 32], sizes = [2, 32], strides = [1, 1]} : vector<2x64xf32> to vector<2x32xf32>
    %452 = vector.extract_strided_slice %421 {offsets = [0, 0], sizes = [2, 32], strides = [1, 1]} : vector<2x96xf32> to vector<2x32xf32>
    %453 = vector.extract_strided_slice %450 {offsets = [0, 0], sizes = [2, 32], strides = [1, 1]} : vector<2x96xf32> to vector<2x32xf32>
    %454 = arith.addf %452, %453 : vector<2x32xf32>
    %455 = arith.negf %454 : vector<2x32xf32>
    %456 = math.exp %455 : vector<2x32xf32>
    %cst_84 = arith.constant 1.000000e+00 : f32
    %457 = vector.broadcast %cst_84 : f32 to vector<2x32xf32>
    %458 = arith.addf %457, %456 : vector<2x32xf32>
    %459 = arith.divf %457, %458 : vector<2x32xf32>
    %460 = vector.extract_strided_slice %421 {offsets = [0, 32], sizes = [2, 32], strides = [1, 1]} : vector<2x96xf32> to vector<2x32xf32>
    %461 = vector.extract_strided_slice %450 {offsets = [0, 32], sizes = [2, 32], strides = [1, 1]} : vector<2x96xf32> to vector<2x32xf32>
    %462 = arith.addf %460, %461 : vector<2x32xf32>
    %463 = arith.negf %462 : vector<2x32xf32>
    %464 = math.exp %463 : vector<2x32xf32>
    %cst_85 = arith.constant 1.000000e+00 : f32
    %465 = vector.broadcast %cst_85 : f32 to vector<2x32xf32>
    %466 = arith.addf %465, %464 : vector<2x32xf32>
    %467 = arith.divf %465, %466 : vector<2x32xf32>
    %468 = vector.extract_strided_slice %421 {offsets = [0, 64], sizes = [2, 32], strides = [1, 1]} : vector<2x96xf32> to vector<2x32xf32>
    %469 = vector.extract_strided_slice %450 {offsets = [0, 64], sizes = [2, 32], strides = [1, 1]} : vector<2x96xf32> to vector<2x32xf32>
    %470 = arith.mulf %459, %469 : vector<2x32xf32>
    %471 = arith.addf %468, %470 : vector<2x32xf32>
    %472 = math.tanh %471 : vector<2x32xf32>
    %cst_86 = arith.constant 1.000000e+00 : f32
    %473 = vector.broadcast %cst_86 : f32 to vector<2x32xf32>
    %474 = arith.subf %473, %467 : vector<2x32xf32>
    %475 = arith.mulf %474, %472 : vector<2x32xf32>
    %476 = arith.mulf %467, %451 : vector<2x32xf32>
    %477 = arith.addf %475, %476 : vector<2x32xf32>
    %c6_87 = arith.constant 6 : index
    %c0_88 = arith.constant 0 : index
    %c0_89 = arith.constant 0 : index
    %478 = vector.load %arg7[%c6_87, %c0_88, %c0_89] : memref<8x2x64xf32, #tpu.memory_space<vmem>>, vector<1x2x32xf32>
    %479 = vector.shape_cast %478 : vector<1x2x32xf32> to vector<2x32xf32>
    %480 = vector.shape_cast %449 : vector<2x32xf32> to vector<1x2x32xf32>
    tpu.vector_store %arg7[%c6_87, %c0_88, %c0_89], %480 {strides = array<i32>} : memref<8x2x64xf32, #tpu.memory_space<vmem>>, vector<1x2x32xf32>,
    %c1_90 = arith.constant 1 : index
    %c0_91 = arith.constant 0 : index
    %c32_92 = arith.constant 32 : index
    %481 = vector.load %arg7[%c1_90, %c0_91, %c32_92] : memref<8x2x64xf32, #tpu.memory_space<vmem>>, vector<1x2x32xf32>
    %482 = vector.shape_cast %481 : vector<1x2x32xf32> to vector<2x32xf32>
    %483 = vector.shape_cast %477 : vector<2x32xf32> to vector<1x2x32xf32>
    tpu.vector_store %arg7[%c1_90, %c0_91, %c32_92], %483 {strides = array<i32>} : memref<8x2x64xf32, #tpu.memory_space<vmem>>, vector<1x2x32xf32>,
    %484 = tpu.concatenate %449, %477 in 1 : vector<2x32xf32>, vector<2x32xf32> -> vector<2x64xf32>
    %cst_93 = arith.constant dense<0.000000e+00> : vector<2x192xf32>
    %485 = tpu.matmul %484, %6, %cst_93 {dimension_numbers = #tpu.dot_dimension_numbers<[1], [0], [0], [1], [0, 0, 1, 1], [], []>} : vector<2x64xf32>, vector<64x192xf32>, vector<2x192xf32> -> vector<2x192xf32>
    %486 = vector.broadcast %7 : vector<1x192xf32> to vector<2x192xf32>
    %487 = arith.addf %485, %486 : vector<2x192xf32>
    %488 = vector.extract_strided_slice %5 {offsets = [14, 0], sizes = [2, 96], strides = [1, 1]} : vector<16x192xf32> to vector<2x96xf32>
    %489 = vector.extract_strided_slice %5 {offsets = [0, 96], sizes = [2, 96], strides = [1, 1]} : vector<16x192xf32> to vector<2x96xf32>
    %490 = vector.extract_strided_slice %487 {offsets = [0, 0], sizes = [2, 96], strides = [1, 1]} : vector<2x192xf32> to vector<2x96xf32>
    %491 = vector.extract_strided_slice %484 {offsets = [0, 0], sizes = [2, 32], strides = [1, 1]} : vector<2x64xf32> to vector<2x32xf32>
    %492 = vector.extract_strided_slice %488 {offsets = [0, 0], sizes = [2, 32], strides = [1, 1]} : vector<2x96xf32> to vector<2x32xf32>
    %493 = vector.extract_strided_slice %490 {offsets = [0, 0], sizes = [2, 32], strides = [1, 1]} : vector<2x96xf32> to vector<2x32xf32>
    %494 = arith.addf %492, %493 : vector<2x32xf32>
    %495 = arith.negf %494 : vector<2x32xf32>
    %496 = math.exp %495 : vector<2x32xf32>
    %cst_94 = arith.constant 1.000000e+00 : f32
    %497 = vector.broadcast %cst_94 : f32 to vector<2x32xf32>
    %498 = arith.addf %497, %496 : vector<2x32xf32>
    %499 = arith.divf %497, %498 : vector<2x32xf32>
    %500 = vector.extract_strided_slice %488 {offsets = [0, 32], sizes = [2, 32], strides = [1, 1]} : vector<2x96xf32> to vector<2x32xf32>
    %501 = vector.extract_strided_slice %490 {offsets = [0, 32], sizes = [2, 32], strides = [1, 1]} : vector<2x96xf32> to vector<2x32xf32>
    %502 = arith.addf %500, %501 : vector<2x32xf32>
    %503 = arith.negf %502 : vector<2x32xf32>
    %504 = math.exp %503 : vector<2x32xf32>
    %cst_95 = arith.constant 1.000000e+00 : f32
    %505 = vector.broadcast %cst_95 : f32 to vector<2x32xf32>
    %506 = arith.addf %505, %504 : vector<2x32xf32>
    %507 = arith.divf %505, %506 : vector<2x32xf32>
    %508 = vector.extract_strided_slice %488 {offsets = [0, 64], sizes = [2, 32], strides = [1, 1]} : vector<2x96xf32> to vector<2x32xf32>
    %509 = vector.extract_strided_slice %490 {offsets = [0, 64], sizes = [2, 32], strides = [1, 1]} : vector<2x96xf32> to vector<2x32xf32>
    %510 = arith.mulf %499, %509 : vector<2x32xf32>
    %511 = arith.addf %508, %510 : vector<2x32xf32>
    %512 = math.tanh %511 : vector<2x32xf32>
    %cst_96 = arith.constant 1.000000e+00 : f32
    %513 = vector.broadcast %cst_96 : f32 to vector<2x32xf32>
    %514 = arith.subf %513, %507 : vector<2x32xf32>
    %515 = arith.mulf %514, %512 : vector<2x32xf32>
    %516 = arith.mulf %507, %491 : vector<2x32xf32>
    %517 = arith.addf %515, %516 : vector<2x32xf32>
    %518 = vector.extract_strided_slice %487 {offsets = [0, 96], sizes = [2, 96], strides = [1, 1]} : vector<2x192xf32> to vector<2x96xf32>
    %519 = vector.extract_strided_slice %484 {offsets = [0, 32], sizes = [2, 32], strides = [1, 1]} : vector<2x64xf32> to vector<2x32xf32>
    %520 = vector.extract_strided_slice %489 {offsets = [0, 0], sizes = [2, 32], strides = [1, 1]} : vector<2x96xf32> to vector<2x32xf32>
    %521 = vector.extract_strided_slice %518 {offsets = [0, 0], sizes = [2, 32], strides = [1, 1]} : vector<2x96xf32> to vector<2x32xf32>
    %522 = arith.addf %520, %521 : vector<2x32xf32>
    %523 = arith.negf %522 : vector<2x32xf32>
    %524 = math.exp %523 : vector<2x32xf32>
    %cst_97 = arith.constant 1.000000e+00 : f32
    %525 = vector.broadcast %cst_97 : f32 to vector<2x32xf32>
    %526 = arith.addf %525, %524 : vector<2x32xf32>
    %527 = arith.divf %525, %526 : vector<2x32xf32>
    %528 = vector.extract_strided_slice %489 {offsets = [0, 32], sizes = [2, 32], strides = [1, 1]} : vector<2x96xf32> to vector<2x32xf32>
    %529 = vector.extract_strided_slice %518 {offsets = [0, 32], sizes = [2, 32], strides = [1, 1]} : vector<2x96xf32> to vector<2x32xf32>
    %530 = arith.addf %528, %529 : vector<2x32xf32>
    %531 = arith.negf %530 : vector<2x32xf32>
    %532 = math.exp %531 : vector<2x32xf32>
    %cst_98 = arith.constant 1.000000e+00 : f32
    %533 = vector.broadcast %cst_98 : f32 to vector<2x32xf32>
    %534 = arith.addf %533, %532 : vector<2x32xf32>
    %535 = arith.divf %533, %534 : vector<2x32xf32>
    %536 = vector.extract_strided_slice %489 {offsets = [0, 64], sizes = [2, 32], strides = [1, 1]} : vector<2x96xf32> to vector<2x32xf32>
    %537 = vector.extract_strided_slice %518 {offsets = [0, 64], sizes = [2, 32], strides = [1, 1]} : vector<2x96xf32> to vector<2x32xf32>
    %538 = arith.mulf %527, %537 : vector<2x32xf32>
    %539 = arith.addf %536, %538 : vector<2x32xf32>
    %540 = math.tanh %539 : vector<2x32xf32>
    %cst_99 = arith.constant 1.000000e+00 : f32
    %541 = vector.broadcast %cst_99 : f32 to vector<2x32xf32>
    %542 = arith.subf %541, %535 : vector<2x32xf32>
    %543 = arith.mulf %542, %540 : vector<2x32xf32>
    %544 = arith.mulf %535, %519 : vector<2x32xf32>
    %545 = arith.addf %543, %544 : vector<2x32xf32>
    %c7_100 = arith.constant 7 : index
    %c0_101 = arith.constant 0 : index
    %c0_102 = arith.constant 0 : index
    %546 = vector.load %arg7[%c7_100, %c0_101, %c0_102] : memref<8x2x64xf32, #tpu.memory_space<vmem>>, vector<1x2x32xf32>
    %547 = vector.shape_cast %546 : vector<1x2x32xf32> to vector<2x32xf32>
    %548 = vector.shape_cast %517 : vector<2x32xf32> to vector<1x2x32xf32>
    tpu.vector_store %arg7[%c7_100, %c0_101, %c0_102], %548 {strides = array<i32>} : memref<8x2x64xf32, #tpu.memory_space<vmem>>, vector<1x2x32xf32>,
    %c0_103 = arith.constant 0 : index
    %c0_104 = arith.constant 0 : index
    %c32_105 = arith.constant 32 : index
    %549 = vector.load %arg7[%c0_103, %c0_104, %c32_105] : memref<8x2x64xf32, #tpu.memory_space<vmem>>, vector<1x2x32xf32>
    %550 = vector.shape_cast %549 : vector<1x2x32xf32> to vector<2x32xf32>
    %551 = vector.shape_cast %545 : vector<2x32xf32> to vector<1x2x32xf32>
    tpu.vector_store %arg7[%c0_103, %c0_104, %c32_105], %551 {strides = array<i32>} : memref<8x2x64xf32, #tpu.memory_space<vmem>>, vector<1x2x32xf32>,
    %552 = tpu.concatenate %517, %545 in 1 : vector<2x32xf32>, vector<2x32xf32> -> vector<2x64xf32>
    %c0_106 = arith.constant 0 : index
    %c0_107 = arith.constant 0 : index
    %553 = vector.load %arg5[%c0_106, %c0_107] : memref<64x24xf32, #tpu.memory_space<vmem>>, vector<64x24xf32>
    %cst_108 = arith.constant dense<0.000000e+00> : vector<2x24xf32>
    %554 = tpu.matmul %552, %553, %cst_108 {dimension_numbers = #tpu.dot_dimension_numbers<[1], [0], [0], [1], [0, 0, 1, 1], [], []>} : vector<2x64xf32>, vector<64x24xf32>, vector<2x24xf32> -> vector<2x24xf32>
    %c0_109 = arith.constant 0 : index
    %c0_110 = arith.constant 0 : index
    %555 = vector.load %arg6[%c0_109, %c0_110] : memref<1x24xf32, #tpu.memory_space<vmem>>, vector<1x24xf32>
    %556 = vector.broadcast %555 : vector<1x24xf32> to vector<2x24xf32>
    %557 = arith.addf %554, %556 : vector<2x24xf32>
    %558 = math.tanh %557 : vector<2x24xf32>
    %c0_111 = arith.constant 0 : index
    %c0_112 = arith.constant 0 : index
    %559 = vector.load %arg8[%c0_111, %c0_112] : memref<2x24xf32, #tpu.memory_space<vmem>>, vector<2x24xf32>
    tpu.vector_store %arg8[%c0_111, %c0_112], %558 {strides = array<i32>} : memref<2x24xf32, #tpu.memory_space<vmem>>, vector<2x24xf32>,
    return
  }
}

</mosaic_0001>

<bundles_post_ra>
// kernel: tpu_custom_call.1
= control target key start
LH: loop header
LB: loop body
LE: loop exit
PB: predicated region body
PF: predicated region fallthrough
CT: control target
= control target key end

     0   :  { %14 = vsyncpa [#allocation3], 0  ;;  %s2470_s0 = inlined_call_operand.vmem [shape: f32[16,16], index: 0, kind: input, shape index: {}]   ;;  %s2471_s1 = inlined_call_operand.vmem [shape: f32[16,192], index: 1, kind: input, shape index: {}]   ;;  %s2472_s2 = inlined_call_operand.hbm [shape: f32[64,192], index: 2, kind: input, shape index: {}]   ;;  %s2473_s3 = inlined_call_operand.vmem [shape: f32[1,192], index: 3, kind: input, shape index: {}]   ;;  %s2474_s4 = inlined_call_operand.vmem [shape: f32[1,192], index: 4, kind: input, shape index: {}]   ;;  %s2475_s5 = inlined_call_operand.vmem [shape: f32[64,24], index: 5, kind: input, shape index: {}]   ;;  %s2476_s6 = inlined_call_operand.vmem [shape: f32[1,24], index: 6, kind: input, shape index: {}]   ;;  %s2477_s7 = inlined_call_operand.hbm [shape: f32[8,2,64], index: 7, kind: output, shape index: {0}]   ;;  %s2478_s8 = inlined_call_operand.hbm [shape: f32[2,24], index: 8, kind: output, shape index: {1}]  }
   0x1   :  { %15 = vsyncpa [#allocation4], 0 }
   0x2   :  { %16 = vsyncpa [#allocation7], 0  ;;  %s2010_s27 = smov [#allocation2]   ;;  %s1938_s9 = scalar_lea.hbm %s2472_s2, 2048 }
   0x3   :  { %s26_s28 = sshll.u32 %s2010_s27, 4  ;;  %p1939_p0 = scmp.ne.s32.totalorder %s2472_s2, %s1938_s9  ;;  %s27_s28 = int_to_ptr.vmem [resolvable:$true] %s26_s28 }
   0x4   :  { %p1942_p1 = scmp.lt.u32.totalorder %s1938_s9, %s2472_s2 }
   0x6   :  { %p1944_p2 = pnand %p1942_p1, %p1939_p0 }
   0x8   :  { %1947 = shalt.err (!%p1944_p2)
}
   0x9   :  { %s1948_s14 = scalar_lea.vmem %s27_s28, 2048  ;;  %p1953_p4 = scmp.lt.s32.totalorder %s27_s28, %s27_s28 }
   0xa   :  { %p1949_p3 = scmp.ne.s32.totalorder %s27_s28, %s1948_s14  ;;  %p1954_p5 = scmp.lt.s32.totalorder %s1948_s14, %s1948_s14 }
   0xc   :  { %p1955_p6 = por %p1954_p5, %p1953_p4 }
   0xe   :  { %p1956_p7 = pnand %p1955_p6, %p1949_p3 }
  0x10   :  { %1959 = shalt.err (!%p1956_p7)
}
  0x11   :  { %s2011_s15 = smov 256   ;;  %s2012_s16 = smov 16  }
  0x12   :  { %32 = dma.hbm_to_vmem [thread:$0]  %s2472_s2, 2048, %s27_s28, [#allocation3], %s2011_s15, %s2011_s15, %s2012_s16  }
  0x13   :  { %2004 = dma.done.wait [#allocation3], 2048  }
  0x14   :  { %2005 = vsyncadd [#allocation3], 4294965248  ;;  %v2013_v0 = vmov 0.0   ;;  %v147_v1 = vld [vmem:[#allocation2 + $0x8] sm:$0xff]  ;;  %v149_v2 = vld [vmem:[#allocation2 + $0x18] sm:$0xff]  ;;  %vm62_vm0 = vcmask 130048   ;;  %v52_v33 = vlaneseq }
  0x15   :  { %133 = vmatprep.mubr.f32.mxu0 %v2013_v0  ;;  %242 = vmatprep.mubr.f32.mxu1 %v2013_v0  ;;  %v146_v3 = vld [vmem:[#allocation2] sm:$0xff]  ;;  %v2081_v4 = vpack.c.bf16 %v149_v2, %v147_v1  ;;  %v148_v5 = vld [vmem:[#allocation2 + $0x10] sm:$0xff]  ;;  %v151_v6 = vld [vmem:[#allocation2 + $0x28] sm:$0xff]  ;;  %s2016_s10 = smov 32   ;;  %vm316_vm1 = vcmask 254976   ;;  %vm329_vm2 = vcmask 261120  }
  0x16   :  { %v153_v7 = vld [vmem:[#allocation2 + $0x38] sm:$0xff]  ;;  %v2083_v8 = vpack.c.bf16 %v148_v5, %v146_v3  ;;  %v150_v10 = vld [vmem:[#allocation2 + $0x20] sm:$0xff]  ;;  %v152_v11 = vld [vmem:[#allocation2 + $0x30] sm:$0xff]  ;;  %v53_v34 = vshrl.u32 %v52_v33, 7  ;;  %vm174_vm3 = vcmask 523264   ;;  %vm483_vm4 = vcmask 257026  }
  0x17   :  { %v2085_v9 = vpack.c.bf16 %v153_v7, %v151_v6  ;;  %v155_v12 = vld [vmem:[#allocation2 + $0x48] sm:$0xff]  ;;  %1657 = vmatprep.subr.bf16.mxu1 %v2081_v4  ;;  %v157_v13 = vld [vmem:[#allocation2 + $0x58] sm:$0xff]  ;;  %v2089_v14 = vpack.c.bf16 %v152_v11, %v150_v10  ;;  %v46_v17 = vld [vmem:[%s2471_s1] sm:$0xff]  ;;  %vm649_vm5 = vcmask 259076   ;;  %vm811_vm6 = vcmask 261126  }
  0x18   :  { %1659 = vmatpush1.bf16.msra.mxu1 %v2083_v8  ;;  %v47_v15 = vld [vmem:[%s2471_s1 + $0x8] sm:$0xff]  ;;  %v49_v16 = vld [vmem:[%s2471_s1 + $0x18] sm:$0xff]  ;;  %v2101_v18 = vpack.c.bf16 %v157_v13, %v155_v12  ;;  %v154_v19 = vld [vmem:[#allocation2 + $0x40] sm:$0xff]  ;;  %v58_v35 = vsub.s32 1, %v53_v34  ;;  %v54_v46 = vsub.s32 0, %v53_v34  ;;  %vm2018_vm7 = vmmov 0  }
  0x19   :  { %1661 = vmatprep.subr.bf16.mxu1 %v2085_v9  ;;  %v156_v20 = vld [vmem:[#allocation2 + $0x50] sm:$0xff]  ;;  %v1652_v21 = vpack.c.bf16 %v49_v16, %v47_v15  ;;  %v159_v24 = vld [vmem:[#allocation2 + $0x68] sm:$0xff]  ;;  %v161_v25 = vld [vmem:[#allocation2 + $0x78] sm:$0xff]  ;;  %vm490_vm8 = vcmask 521476   ;;  %vm323_vm9 = vcmask 523526   ;;  %vm818_vm10 = vcmask 517376  }
  0x1a   :  { %v48_v22 = vld [vmem:[%s2471_s1 + $0x10] sm:$0xff]  ;;  %v2107_v26 = vpack.c.bf16 %v156_v20, %v154_v19  ;;  %v44_v27 = vld [vmem:[%s2470_s0] sm:$0xff]  ;;  %v2113_v28 = vpack.c.bf16 %v161_v25, %v159_v24  ;;  %v45_v32 = vld [vmem:[%s2470_s0 + $0x8] sm:$0xff]  ;;  %vm656_vm11 = vcmask 519426  }
  0x1b   :  { %v1654_v23 = vpack.c.bf16 %v48_v22, %v46_v17  ;;  %1653 = vmatprep.subr.bf16.mxu0 %v1652_v21  ;;  %v158_v29 = vld [vmem:[#allocation2 + $0x60] sm:$0xff]  ;;  %v160_v30 = vld [vmem:[#allocation2 + $0x70] sm:$0xff] }
  0x1c   :  { %1663 = vmatpush1.bf16.msra.mxu1 %v2089_v14  ;;  %v2117_v31 = vpack.c.bf16 %v160_v30, %v158_v29  ;;  %v50_v36 = vld [vmem:[%s2473_s3] sm:$0x3]  ;;  %s2014_s3 = smov 64  }
  0x1d   :  { %1655 = vmatpush1.bf16.msra.mxu0 %v1654_v23  ;;  %1665 = vmatprep.subr.bf16.mxu1 %v2101_v18  ;;  %v59_v38 = vrot.slane %v50_v36, %v58_v35  ;;  %v162_v41 = vld [vmem:[%s2474_s4] sm:$0x3]  ;;  %v55_v53 = vrot.slane %v50_v36, %v54_v46  ;;  %s2015_s4 = smov 96  }
  0x1e   :  { %1673 = vmatprep.subr.bf16.mxu0 %v2081_v4  ;;  %v2153_v44 = vrot.slane %v162_v41, %v58_v35  ;;  %v2158_v50 = vrot.slane %v162_v41, %v54_v46 }
  0x20   :  { %1589 = vmatmul.mubr.msk.f32.vlgmr.msra.gmra.mrb[0].mxu0 %vm62_vm0, %v44_v27  ;;  %1667 = vmatpush1.bf16.msra.mxu1 %v2107_v26 }
  0x21   :  { %139 = vmatprep.mubr.f32.mxu0 %v2013_v0  ;;  %1669 = vmatprep.subr.bf16.mxu1 %v2113_v28 }
  0x22   :  { %1675 = vmatpush1.bf16.msra.mxu0 %v2083_v8 }
  0x23   :  { %1677 = vmatprep.subr.bf16.mxu0 %v2085_v9 }
  0x24   :  { %1590 = vmatmul.mubr.msk.f32.gmra.mrb[2].mxu0 %vm62_vm0, %v45_v32  ;;  %1671 = vmatpush1.bf16.msra.mxu1 %v2117_v31 }
  0x25   :  { %398 = vmatprep.mubr.f32.mxu0 %v2013_v0  ;;  %1689 = vmatprep.subr.bf16.mxu1 %v2081_v4 }
  0x26   :  { %1679 = vmatpush1.bf16.msra.mxu0 %v2089_v14 }
  0x27   :  { %1681 = vmatprep.subr.bf16.mxu0 %v2101_v18  ;;  %243 = vmatmul.mubr.f32.vlgmr.msra.gmra.mrb[0].mxu1 %v2013_v0 }
  0x28   :  { %1691 = vmatpush1.bf16.msra.mxu1 %v2083_v8  ;;  %565 = vmatprep.mubr.f32.mxu1 %v2013_v0 }
  0x29   :  { %1693 = vmatprep.subr.bf16.mxu1 %v2085_v9 }
  0x2a   :  { %1683 = vmatpush1.bf16.msra.mxu0 %v2107_v26 }
  0x2b   :  { %1685 = vmatprep.subr.bf16.mxu0 %v2113_v28 }
  0x2c   :  { %1695 = vmatpush1.bf16.msra.mxu1 %v2089_v14 }
  0x2d   :  { %1697 = vmatprep.subr.bf16.mxu1 %v2101_v18 }
  0x2e   :  { %1687 = vmatpush1.bf16.msra.mxu0 %v2117_v31 }
  0x2f   :  { %1705 = vmatprep.subr.bf16.mxu0 %v2081_v4 }
  0x30   :  { %1699 = vmatpush1.bf16.msra.mxu1 %v2107_v26 }
  0x31   :  { %1701 = vmatprep.subr.bf16.mxu1 %v2113_v28 }
  0x34   :  { %1703 = vmatpush1.bf16.msra.mxu1 %v2117_v31 }
  0x35   :  { %1721 = vmatprep.subr.bf16.mxu1 %v2081_v4 }
  0xf3   :  { %v135_v37 = vpop.f32.mrb[0].mxu0 }
  0xf4   :  { %v137_v39 = vpop.f32.mrb[1].mxu0  ;;  %v2165_v56 = vadd.f32 %v135_v37, %v55_v53 }
  0xf5   :  { %v2148_v40 = vadd.f32 %v137_v39, %v59_v38 }
  0xf7   :  { %v141_v42 = vpop.f32.mrb[2].mxu0 }
  0xf8   :  { %v143_v43 = vpop.f32.mrb[3].mxu0  ;;  %v2163_v55 = vadd.f32 %v141_v42, %v55_v53 }
  0xf9   :  { %v2155_v45 = vadd.f32 %v143_v43, %v59_v38 }
  0xfa   :  { %v244_v47 = vpop.f32.mrb[0].mxu1 }
  0xfb   :  { %v246_v48 = vpop.f32.mrb[1].mxu1  ;;  %v245_v52 = vadd.f32 %v244_v47, %v2158_v50 }
  0xfc   :  { %v247_v49 = vadd.f32 %v246_v48, %v2153_v44 }
  0xfd   :  { %v275_v54 = vrot.slane %v245_v52, 2  ;;  %v249_v58 = vadd.f32 %v245_v52, %v2165_v56 }
  0xfe   :  { %v285_v51 = vrot.slane %v247_v49, 2 }
  0xff   :  { %v277_v57 = vadd.f32 %v275_v54, %v2163_v55  ;;  %v1591_v60 = vmul.f32 -1.442695, %v249_v58 }
 0x100   :  { %294 = vrot.lane.b32.xlu0 %v285_v51, %s2014_s3  ;;  %v287_v19 = vadd.f32 %v285_v51, %v2155_v45 }
 0x101   :  { %v1592_v59 = vmul.f32 -1.442695, %v277_v57 }
 0x102   :  { %v1593_v20 = vmul.f32 -1.442695, %v287_v19 }
 0x103   :  { %1808 = vpow2.f32 %v1592_v59 }
 0x104   :  { %257 = vrot.lane.b32.xlu0 %v245_v52, %s2014_s3  ;;  %1810 = vpow2.f32 %v1591_v60 }
 0x10d   :  { %v1809_v61 = vpop.eup %1808 }
 0x10e   :  { %v281_v62 = vadd.f32 1.0, %v1809_v61  ;;  %v1811_v63 = vpop.eup %1810 }
 0x10f   :  { %v253_v1 = vadd.f32 1.0, %v1811_v63 }
 0x110   :  { %1812 = vrcp.f32 %v281_v62 }
 0x111   :  { %1814 = vrcp.f32 %v253_v1 }
 0x11a   :  { %v1813_v2 = vpop.eup %1812 }
 0x11b   :  { %v1815_v6 = vpop.eup %1814 }
 0x11c   :  { %v267_v32 = vsub.f32 1.0, %v1815_v6  ;;  %v273_v34 = vmul.f32 0.0, %v1815_v6 }
 0x172   :  { %v295_v3 = vpop.permute.xlu0 %294 }
 0x173   :  { %v297_v5 = vmul.f32 %v1813_v2, %v295_v3 }
 0x175   :  { %299 = vrot.lane.b32.xlu1 %v297_v5, %s2014_s3 }
 0x176   :  { %v258_v7 = vpop.permute.xlu0 %257 }
 0x177   :  { %v260_v10 = vmul.f32 %v1815_v6, %v258_v7 }
 0x179   :  { %262 = vrot.lane.b32.xlu1 %v260_v10, %s2014_s3 }
 0x1e7   :  { %v300_v11 = vpop.permute.xlu1 %299 }
 0x1e8   :  { %v302_v12 = vadd.f32 %v300_v11, %v2155_v45 }
 0x1ea   :  { %1816 = vtanh.f32 %v302_v12 }
 0x1eb   :  { %v263_v13 = vpop.permute.xlu1 %262 }
 0x1ec   :  { %v265_v15 = vadd.f32 %v263_v13, %v2165_v56 }
 0x1ee   :  { %1818 = vtanh.f32 %v265_v15 }
 0x1ef   :  { %1820 = vpow2.f32 %v1593_v20 }
 0x1f4   :  { %v1817_v16 = vpop.eup %1816 }
 0x1f5   :  { %306 = vrot.lane.b32.xlu0 %v1817_v16, %s2015_s4 }
 0x1f8   :  { %v1819_v17 = vpop.eup %1818 }
 0x1f9   :  { %269 = vrot.lane.b32.xlu1 %v1819_v17, %s2015_s4  ;;  %v1821_v21 = vpop.eup %1820 }
 0x1fa   :  { %v291_v22 = vadd.f32 1.0, %v1821_v21 }
 0x1fc   :  { %1822 = vrcp.f32 %v291_v22 }
 0x206   :  { %v1823_v23 = vpop.eup %1822 }
 0x207   :  { %v304_v24 = vsub.f32 1.0, %v1823_v23  ;;  %v310_v27 = vmul.f32 0.0, %v1823_v23 }
 0x267   :  { %v307_v25 = vpop.permute.xlu0 %306 }
 0x268   :  { %v309_v29 = vmul.f32 %v307_v25, %v304_v24 }
 0x26a   :  { %v2176_v30 = vadd.f32 %v310_v27, %v309_v29 }
 0x26b   :  { %v270_v33 = vpop.permute.xlu1 %269 }
 0x26c   :  { %v272_v35 = vmul.f32 %v270_v33, %v267_v32  ;;  %v325_v36 = vrot.slane %v2176_v30, 6 }
 0x26e   :  { %v274_v37 = vadd.f32 %v273_v34, %v272_v35  ;;  %326 = vrot.lane.b32.xlu1 %v325_v36, %s2016_s10 }
 0x270   :  { %313 = vrot.lane.b32.xlu0 %v274_v37, %s2015_s4 }
 0x2e0   :  { %v327_v38 = vpop.permute.xlu1 %326 }
 0x2e2   :  { %v314_v39 = vpop.permute.xlu0 %313 }
 0x2e3   :  { %317 = vst.msk [vmem:[#allocation5] sm:$0x3] %vm316_vm1, %v314_v39  ;;  %v330_v41 = vsel %vm329_vm2, %v314_v39, %v327_v38 }
 0x2e4   :  { %1594 = vmatmul.mubr.msk.f32.vlgmr.msra.gmra.mrb[4].mxu0 %vm174_vm3, %v330_v41  ;;  %v472_v6 = vrot.slane %v330_v41, 4  ;;  %v431_v7 = vrot.slane %v330_v41, 6 }
 0x2e5   :  { %1707 = vmatpush1.bf16.msra.mxu0 %v2083_v8  ;;  %731 = vmatprep.mubr.f32.mxu0 %v2013_v0 }
 0x2e6   :  { %1709 = vmatprep.subr.bf16.mxu0 %v2085_v9 }
 0x2e9   :  { %1711 = vmatpush1.bf16.msra.mxu0 %v2089_v14 }
 0x2ea   :  { %1713 = vmatprep.subr.bf16.mxu0 %v2101_v18 }
 0x2ed   :  { %1715 = vmatpush1.bf16.msra.mxu0 %v2107_v26 }
 0x2ee   :  { %1717 = vmatprep.subr.bf16.mxu0 %v2113_v28 }
 0x2f1   :  { %1719 = vmatpush1.bf16.msra.mxu0 %v2117_v31 }
 0x2f2   :  { %1737 = vmatprep.subr.bf16.mxu0 %v2081_v4 }
 0x3b7   :  { %v400_v42 = vpop.f32.mrb[4].mxu0 }
 0x3b8   :  { %v401_v43 = vadd.f32 %v400_v42, %v2158_v50  ;;  %v402_v46 = vpop.f32.mrb[5].mxu0 }
 0x3b9   :  { %v403_v47 = vadd.f32 %v402_v46, %v2153_v44 }
 0x3ba   :  { %v406_v48 = vrot.slane %v401_v43, 6  ;;  %v437_v51 = vrot.slane %v401_v43, 4 }
 0x3bb   :  { %v447_v49 = vrot.slane %v403_v47, 4 }
 0x3bc   :  { %415 = vrot.lane.b32.xlu1 %v406_v48, %s2014_s3  ;;  %v408_v52 = vadd.f32 %v406_v48, %v2165_v56  ;;  %v439_v53 = vadd.f32 %v437_v51, %v2163_v55 }
 0x3bd   :  { %456 = vrot.lane.b32.xlu0 %v447_v49, %s2014_s3  ;;  %v449_v17 = vadd.f32 %v447_v49, %v2155_v45 }
 0x3be   :  { %v1595_v54 = vmul.f32 -1.442695, %v408_v52  ;;  %v1596_v57 = vmul.f32 -1.442695, %v439_v53 }
 0x3bf   :  { %v1597_v19 = vmul.f32 -1.442695, %v449_v17 }
 0x3c0   :  { %1824 = vpow2.f32 %v1595_v54 }
 0x3c1   :  { %1826 = vpow2.f32 %v1596_v57 }
 0x3ca   :  { %v1825_v58 = vpop.eup %1824 }
 0x3cb   :  { %v1827_v59 = vpop.eup %1826  ;;  %v412_v60 = vadd.f32 1.0, %v1825_v58 }
 0x3cc   :  { %v443_v61 = vadd.f32 1.0, %v1827_v59 }
 0x3cd   :  { %1828 = vrcp.f32 %v412_v60 }
 0x3ce   :  { %1830 = vrcp.f32 %v443_v61 }
 0x3d7   :  { %v1829_v62 = vpop.eup %1828 }
 0x3d8   :  { %v1831_v1 = vpop.eup %1830  ;;  %v425_v34 = vsub.f32 1.0, %v1829_v62 }
 0x42e   :  { %v416_v63 = vpop.permute.xlu1 %415 }
 0x42f   :  { %v418_v2 = vmul.f32 %v1829_v62, %v416_v63  ;;  %v457_v3 = vpop.permute.xlu0 %456 }
 0x430   :  { %v459_v5 = vmul.f32 %v1831_v1, %v457_v3 }
 0x431   :  { %420 = vrot.lane.b32.xlu1 %v418_v2, %s2014_s3 }
 0x432   :  { %461 = vrot.lane.b32.xlu0 %v459_v5, %s2014_s3 }
 0x435   :  { %473 = vrot.lane.b32.xlu1 %v472_v6, %s2015_s4 }
 0x439   :  { %432 = vrot.lane.b32.xlu1 %v431_v7, %s2016_s10 }
 0x4a3   :  { %v421_v10 = vpop.permute.xlu1 %420 }
 0x4a4   :  { %v462_v11 = vpop.permute.xlu0 %461  ;;  %v423_v13 = vadd.f32 %v421_v10, %v2165_v56 }
 0x4a5   :  { %v464_v12 = vadd.f32 %v462_v11, %v2155_v45 }
 0x4a7   :  { %1832 = vtanh.f32 %v464_v12  ;;  %v474_v23 = vpop.permute.xlu1 %473 }
 0x4a8   :  { %1834 = vtanh.f32 %v423_v13 }
 0x4a9   :  { %1836 = vpow2.f32 %v1597_v19 }
 0x4ab   :  { %v433_v32 = vpop.permute.xlu1 %432 }
 0x4ac   :  { %v435_v36 = vmul.f32 %v1829_v62, %v433_v32 }
 0x4b1   :  { %v1833_v15 = vpop.eup %1832 }
 0x4b2   :  { %468 = vrot.lane.b32.xlu0 %v1833_v15, %s2015_s4  ;;  %v1835_v16 = vpop.eup %1834 }
 0x4b3   :  { %v1837_v20 = vpop.eup %1836 }
 0x4b4   :  { %v453_v21 = vadd.f32 1.0, %v1837_v20 }
 0x4b6   :  { %427 = vrot.lane.b32.xlu0 %v1835_v16, %s2015_s4  ;;  %1838 = vrcp.f32 %v453_v21 }
 0x4c0   :  { %v1839_v22 = vpop.eup %1838 }
 0x4c1   :  { %v466_v24 = vsub.f32 1.0, %v1839_v22  ;;  %v476_v27 = vmul.f32 %v1839_v22, %v474_v23 }
 0x524   :  { %v469_v25 = vpop.permute.xlu0 %468 }
 0x525   :  { %v471_v29 = vmul.f32 %v469_v25, %v466_v24 }
 0x527   :  { %v2208_v33 = vadd.f32 %v476_v27, %v471_v29 }
 0x528   :  { %v428_v35 = vpop.permute.xlu0 %427 }
 0x529   :  { %v430_v37 = vmul.f32 %v428_v35, %v425_v34  ;;  %v492_v38 = vrot.slane %v2208_v33, 2 }
 0x52b   :  { %v436_v39 = vadd.f32 %v435_v36, %v430_v37  ;;  %493 = vrot.lane.b32.xlu1 %v492_v38, %s2016_s10 }
 0x52d   :  { %479 = vrot.lane.b32.xlu0 %v436_v39, %s2015_s4 }
 0x59d   :  { %v494_v41 = vpop.permute.xlu1 %493 }
 0x59f   :  { %v480_v42 = vpop.permute.xlu0 %479 }
 0x5a0   :  { %484 = vst.msk [vmem:[#allocation5] sm:$0xc] %vm483_vm4, %v480_v42  ;;  %v496_v43 = vsel %vm329_vm2, %v480_v42, %v494_v41 }
 0x5a1   :  { %v498_v46 = vrot.slane %v496_v43, 2  ;;  %v598_v11 = vrot.slane %v496_v43, 6 }
 0x5a3   :  { %1598 = vmatmul.mubr.msk.f32.vlgmr.msra.gmra.mrb[2].mxu1 %vm174_vm3, %v498_v46 }
 0x5a4   :  { %1723 = vmatpush1.bf16.msra.mxu1 %v2083_v8  ;;  %893 = vmatprep.mubr.f32.mxu1 %v2013_v0 }
 0x5a5   :  { %1725 = vmatprep.subr.bf16.mxu1 %v2085_v9 }
 0x5a8   :  { %1727 = vmatpush1.bf16.msra.mxu1 %v2089_v14 }
 0x5a9   :  { %1729 = vmatprep.subr.bf16.mxu1 %v2101_v18 }
 0x5ac   :  { %1731 = vmatpush1.bf16.msra.mxu1 %v2107_v26 }
 0x5ad   :  { %1733 = vmatprep.subr.bf16.mxu1 %v2113_v28 }
 0x5b0   :  { %1735 = vmatpush1.bf16.msra.mxu1 %v2117_v31 }
 0x5b1   :  { %1753 = vmatprep.subr.bf16.mxu1 %v2081_v4 }
 0x676   :  { %v567_v47 = vpop.f32.mrb[2].mxu1 }
 0x677   :  { %v568_v48 = vadd.f32 %v567_v47, %v2158_v50  ;;  %v569_v49 = vpop.f32.mrb[3].mxu1 }
 0x678   :  { %v570_v51 = vadd.f32 %v569_v49, %v2153_v44 }
 0x679   :  { %v573_v52 = vrot.slane %v568_v48, 4  ;;  %v604_v54 = vrot.slane %v568_v48, 6 }
 0x67a   :  { %v614_v53 = vrot.slane %v570_v51, 6 }
 0x67b   :  { %582 = vrot.lane.b32.xlu1 %v573_v52, %s2014_s3  ;;  %v575_v57 = vadd.f32 %v573_v52, %v2165_v56  ;;  %v606_v58 = vadd.f32 %v604_v54, %v2163_v55 }
 0x67c   :  { %623 = vrot.lane.b32.xlu0 %v614_v53, %s2014_s3  ;;  %v616_v20 = vadd.f32 %v614_v53, %v2155_v45 }
 0x67d   :  { %v1599_v59 = vmul.f32 -1.442695, %v575_v57  ;;  %v1600_v60 = vmul.f32 -1.442695, %v606_v58 }
 0x67e   :  { %v1601_v21 = vmul.f32 -1.442695, %v616_v20 }
 0x67f   :  { %1840 = vpow2.f32 %v1599_v59 }
 0x680   :  { %1842 = vpow2.f32 %v1600_v60 }
 0x689   :  { %v1841_v61 = vpop.eup %1840 }
 0x68a   :  { %v1843_v62 = vpop.eup %1842  ;;  %v579_v63 = vadd.f32 1.0, %v1841_v61 }
 0x68b   :  { %v610_v1 = vadd.f32 1.0, %v1843_v62 }
 0x68c   :  { %1844 = vrcp.f32 %v579_v63 }
 0x68d   :  { %1846 = vrcp.f32 %v610_v1 }
 0x696   :  { %v1845_v2 = vpop.eup %1844 }
 0x697   :  { %v1847_v5 = vpop.eup %1846  ;;  %v592_v37 = vsub.f32 1.0, %v1845_v2 }
 0x6ed   :  { %v583_v3 = vpop.permute.xlu1 %582 }
 0x6ee   :  { %v585_v6 = vmul.f32 %v1845_v2, %v583_v3  ;;  %v624_v7 = vpop.permute.xlu0 %623 }
 0x6ef   :  { %v626_v10 = vmul.f32 %v1847_v5, %v624_v7 }
 0x6f0   :  { %587 = vrot.lane.b32.xlu1 %v585_v6, %s2014_s3 }
 0x6f1   :  { %628 = vrot.lane.b32.xlu0 %v626_v10, %s2014_s3 }
 0x6f4   :  { %639 = vrot.lane.b32.xlu1 %v496_v43, %s2015_s4 }
 0x6f8   :  { %599 = vrot.lane.b32.xlu1 %v598_v11, %s2016_s10 }
 0x762   :  { %v588_v12 = vpop.permute.xlu1 %587 }
 0x763   :  { %v629_v13 = vpop.permute.xlu0 %628  ;;  %v590_v16 = vadd.f32 %v588_v12, %v2165_v56 }
 0x764   :  { %v631_v15 = vadd.f32 %v629_v13, %v2155_v45 }
 0x766   :  { %1848 = vtanh.f32 %v631_v15  ;;  %v640_v25 = vpop.permute.xlu1 %639 }
 0x767   :  { %1850 = vtanh.f32 %v590_v16 }
 0x768   :  { %1852 = vpow2.f32 %v1601_v21 }
 0x76a   :  { %v600_v35 = vpop.permute.xlu1 %599 }
 0x76b   :  { %v602_v39 = vmul.f32 %v1845_v2, %v600_v35 }
 0x770   :  { %v1849_v17 = vpop.eup %1848 }
 0x771   :  { %635 = vrot.lane.b32.xlu0 %v1849_v17, %s2015_s4  ;;  %v1851_v19 = vpop.eup %1850 }
 0x772   :  { %v1853_v22 = vpop.eup %1852 }
 0x773   :  { %v620_v23 = vadd.f32 1.0, %v1853_v22 }
 0x775   :  { %594 = vrot.lane.b32.xlu0 %v1851_v19, %s2015_s4  ;;  %1854 = vrcp.f32 %v620_v23 }
 0x77f   :  { %v1855_v24 = vpop.eup %1854 }
 0x780   :  { %v633_v27 = vsub.f32 1.0, %v1855_v24  ;;  %v642_v32 = vmul.f32 %v1855_v24, %v640_v25 }
 0x7e3   :  { %v636_v29 = vpop.permute.xlu0 %635 }
 0x7e4   :  { %v638_v34 = vmul.f32 %v636_v29, %v633_v27 }
 0x7e6   :  { %v2240_v36 = vadd.f32 %v642_v32, %v638_v34 }
 0x7e7   :  { %v595_v38 = vpop.permute.xlu0 %594 }
 0x7e8   :  { %v597_v41 = vmul.f32 %v595_v38, %v592_v37  ;;  %v658_v42 = vrot.slane %v2240_v36, 6 }
 0x7ea   :  { %v603_v43 = vadd.f32 %v602_v39, %v597_v41  ;;  %659 = vrot.lane.b32.xlu1 %v658_v42, %s2016_s10 }
 0x7ec   :  { %645 = vrot.lane.b32.xlu0 %v603_v43, %s2015_s4 }
 0x85c   :  { %v660_v46 = vpop.permute.xlu1 %659 }
 0x85e   :  { %v646_v47 = vpop.permute.xlu0 %645 }
 0x85f   :  { %650 = vst.msk [vmem:[#allocation5] sm:$0x30] %vm649_vm5, %v646_v47  ;;  %v662_v48 = vsel %vm329_vm2, %v646_v47, %v660_v46 }
 0x860   :  { %v664_v49 = vrot.slane %v662_v48, 4  ;;  %v764_v11 = vrot.slane %v662_v48, 6 }
 0x862   :  { %1602 = vmatmul.mubr.msk.f32.vlgmr.msra.gmra.mrb[6].mxu0 %vm174_vm3, %v664_v49 }
 0x863   :  { %1739 = vmatpush1.bf16.msra.mxu0 %v2083_v8  ;;  %1051 = vmatprep.mubr.f32.mxu0 %v2013_v0 }
 0x864   :  { %1741 = vmatprep.subr.bf16.mxu0 %v2085_v9 }
 0x867   :  { %1743 = vmatpush1.bf16.msra.mxu0 %v2089_v14 }
 0x868   :  { %1745 = vmatprep.subr.bf16.mxu0 %v2101_v18 }
 0x86b   :  { %1747 = vmatpush1.bf16.msra.mxu0 %v2107_v26 }
 0x86c   :  { %1749 = vmatprep.subr.bf16.mxu0 %v2113_v28 }
 0x86f   :  { %1751 = vmatpush1.bf16.msra.mxu0 %v2117_v31 }
 0x870   :  { %1769 = vmatprep.subr.bf16.mxu0 %v2081_v4 }
 0x935   :  { %v733_v51 = vpop.f32.mrb[6].mxu0 }
 0x936   :  { %v734_v52 = vadd.f32 %v733_v51, %v2158_v50  ;;  %v735_v53 = vpop.f32.mrb[7].mxu0 }
 0x937   :  { %v736_v54 = vadd.f32 %v735_v53, %v2153_v44 }
 0x938   :  { %v739_v57 = vrot.slane %v734_v52, 2  ;;  %v770_v58 = vadd.f32 %v734_v52, %v2163_v55 }
 0x939   :  { %785 = vrot.lane.b32.xlu0 %v736_v54, %s2014_s3  ;;  %v777_v20 = vadd.f32 %v736_v54, %v2155_v45 }
 0x93a   :  { %748 = vrot.lane.b32.xlu1 %v739_v57, %s2014_s3  ;;  %v741_v59 = vadd.f32 %v739_v57, %v2165_v56  ;;  %v1604_v60 = vmul.f32 -1.442695, %v770_v58 }
 0x93b   :  { %v1605_v21 = vmul.f32 -1.442695, %v777_v20 }
 0x93c   :  { %v1603_v61 = vmul.f32 -1.442695, %v741_v59  ;;  %1856 = vpow2.f32 %v1604_v60 }
 0x93e   :  { %1858 = vpow2.f32 %v1603_v61 }
 0x946   :  { %v1857_v4 = vpop.eup %1856 }
 0x947   :  { %v774_v63 = vadd.f32 1.0, %v1857_v4 }
 0x948   :  { %v1859_v62 = vpop.eup %1858 }
 0x949   :  { %v745_v1 = vadd.f32 1.0, %v1859_v62  ;;  %1860 = vrcp.f32 %v774_v63 }
 0x94b   :  { %1862 = vrcp.f32 %v745_v1 }
 0x953   :  { %v1861_v2 = vpop.eup %1860 }
 0x955   :  { %v1863_v5 = vpop.eup %1862 }
 0x956   :  { %v758_v38 = vsub.f32 1.0, %v1863_v5 }
 0x9ab   :  { %v786_v3 = vpop.permute.xlu0 %785 }
 0x9ac   :  { %v788_v6 = vmul.f32 %v1861_v2, %v786_v3  ;;  %v749_v7 = vpop.permute.xlu1 %748 }
 0x9ad   :  { %v751_v10 = vmul.f32 %v1863_v5, %v749_v7 }
 0x9ae   :  { %790 = vrot.lane.b32.xlu0 %v788_v6, %s2014_s3 }
 0x9af   :  { %753 = vrot.lane.b32.xlu1 %v751_v10, %s2014_s3 }
 0x9b3   :  { %801 = vrot.lane.b32.xlu1 %v664_v49, %s2015_s4 }
 0x9b7   :  { %765 = vrot.lane.b32.xlu1 %v764_v11, %s2016_s10 }
 0xa20   :  { %v791_v12 = vpop.permute.xlu0 %790 }
 0xa21   :  { %v793_v13 = vadd.f32 %v791_v12, %v2155_v45  ;;  %v754_v15 = vpop.permute.xlu1 %753 }
 0xa22   :  { %v756_v16 = vadd.f32 %v754_v15, %v2165_v56 }
 0xa23   :  { %1864 = vtanh.f32 %v793_v13 }
 0xa24   :  { %1866 = vtanh.f32 %v756_v16 }
 0xa25   :  { %1868 = vpow2.f32 %v1605_v21  ;;  %v802_v25 = vpop.permute.xlu1 %801 }
 0xa29   :  { %v766_v35 = vpop.permute.xlu1 %765 }
 0xa2a   :  { %v768_v41 = vmul.f32 %v1863_v5, %v766_v35 }
 0xa2d   :  { %v1865_v17 = vpop.eup %1864 }
 0xa2e   :  { %797 = vrot.lane.b32.xlu0 %v1865_v17, %s2015_s4  ;;  %v1867_v19 = vpop.eup %1866 }
 0xa2f   :  { %v1869_v22 = vpop.eup %1868 }
 0xa30   :  { %v781_v23 = vadd.f32 1.0, %v1869_v22 }
 0xa32   :  { %760 = vrot.lane.b32.xlu0 %v1867_v19, %s2015_s4  ;;  %1870 = vrcp.f32 %v781_v23 }
 0xa3c   :  { %v1871_v24 = vpop.eup %1870 }
 0xa3d   :  { %v795_v27 = vsub.f32 1.0, %v1871_v24  ;;  %v804_v32 = vmul.f32 %v1871_v24, %v802_v25 }
 0xaa0   :  { %v798_v29 = vpop.permute.xlu0 %797 }
 0xaa1   :  { %v800_v34 = vmul.f32 %v798_v29, %v795_v27 }
 0xaa3   :  { %v2272_v37 = vadd.f32 %v804_v32, %v800_v34 }
 0xaa4   :  { %v761_v39 = vpop.permute.xlu0 %760 }
 0xaa5   :  { %v763_v42 = vmul.f32 %v761_v39, %v758_v38  ;;  %v820_v45 = vrot.slane %v2272_v37, 2 }
 0xaa7   :  { %v769_v43 = vadd.f32 %v768_v41, %v763_v42  ;;  %821 = vrot.lane.b32.xlu1 %v820_v45, %s2016_s10 }
 0xaa9   :  { %807 = vrot.lane.b32.xlu0 %v769_v43, %s2015_s4 }
 0xb19   :  { %v822_v46 = vpop.permute.xlu1 %821 }
 0xb1b   :  { %v808_v47 = vpop.permute.xlu0 %807 }
 0xb1c   :  { %812 = vst.msk [vmem:[#allocation5] sm:$0xc0] %vm811_vm6, %v808_v47  ;;  %v824_v48 = vsel %vm329_vm2, %v808_v47, %v822_v46 }
 0xb1d   :  { %v826_v49 = vrot.slane %v824_v48, 6 }
 0xb1f   :  { %1606 = vmatmul.mubr.msk.f32.vlgmr.msra.gmra.mrb[4].mxu1 %vm174_vm3, %v826_v49 }
 0xb20   :  { %1755 = vmatpush1.bf16.msra.mxu1 %v2083_v8  ;;  %1214 = vmatprep.mubr.f32.mxu1 %v2013_v0 }
 0xb21   :  { %1757 = vmatprep.subr.bf16.mxu1 %v2085_v9 }
 0xb24   :  { %1759 = vmatpush1.bf16.msra.mxu1 %v2089_v14 }
 0xb25   :  { %1761 = vmatprep.subr.bf16.mxu1 %v2101_v18 }
 0xb28   :  { %1763 = vmatpush1.bf16.msra.mxu1 %v2107_v26 }
 0xb29   :  { %1765 = vmatprep.subr.bf16.mxu1 %v2113_v28 }
 0xb2c   :  { %1767 = vmatpush1.bf16.msra.mxu1 %v2117_v31 }
 0xbf2   :  { %v895_v51 = vpop.f32.mrb[4].mxu1 }
 0xbf3   :  { %v896_v52 = vadd.f32 %v895_v51, %v2158_v50  ;;  %v897_v53 = vpop.f32.mrb[5].mxu1 }
 0xbf4   :  { %v898_v54 = vadd.f32 %v897_v53, %v2153_v44 }
 0xbf5   :  { %908 = vrot.lane.b32.xlu1 %v896_v52, %s2014_s3  ;;  %v929_v58 = vrot.slane %v896_v52, 2  ;;  %v900_v59 = vadd.f32 %v896_v52, %v2163_v55 }
 0xbf6   :  { %v939_v57 = vrot.slane %v898_v54, 2 }
 0xbf7   :  { %v931_v60 = vadd.f32 %v929_v58, %v2165_v56  ;;  %v1607_v61 = vmul.f32 -1.442695, %v900_v59 }
 0xbf8   :  { %948 = vrot.lane.b32.xlu0 %v939_v57, %s2014_s3  ;;  %v941_v20 = vadd.f32 %v939_v57, %v2148_v40 }
 0xbf9   :  { %v1608_v4 = vmul.f32 -1.442695, %v931_v60  ;;  %1872 = vpow2.f32 %v1607_v61 }
 0xbfa   :  { %v1609_v21 = vmul.f32 -1.442695, %v941_v20 }
 0xbfb   :  { %1874 = vpow2.f32 %v1608_v4 }
 0xc03   :  { %v1873_v62 = vpop.eup %1872 }
 0xc04   :  { %v904_v1 = vadd.f32 1.0, %v1873_v62 }
 0xc05   :  { %v1875_v63 = vpop.eup %1874 }
 0xc06   :  { %v935_v2 = vadd.f32 1.0, %v1875_v63  ;;  %1876 = vrcp.f32 %v904_v1 }
 0xc08   :  { %1878 = vrcp.f32 %v935_v2 }
 0xc10   :  { %v1877_v3 = vpop.eup %1876 }
 0xc11   :  { %v918_v39 = vsub.f32 1.0, %v1877_v3 }
 0xc12   :  { %v1879_v7 = vpop.eup %1878 }
 0xc67   :  { %v909_v5 = vpop.permute.xlu1 %908 }
 0xc68   :  { %v911_v6 = vmul.f32 %v1877_v3, %v909_v5 }
 0xc6a   :  { %v949_v10 = vpop.permute.xlu0 %948  ;;  %913 = vrot.lane.b32.xlu1 %v911_v6, %s2014_s3 }
 0xc6b   :  { %v951_v11 = vmul.f32 %v1879_v7, %v949_v10 }
 0xc6d   :  { %953 = vrot.lane.b32.xlu0 %v951_v11, %s2014_s3 }
 0xc6e   :  { %964 = vrot.lane.b32.xlu1 %v824_v48, %s2015_s4 }
 0xc72   :  { %924 = vrot.lane.b32.xlu1 %v826_v49, %s2016_s10 }
 0xcdc   :  { %v914_v12 = vpop.permute.xlu1 %913 }
 0xcdd   :  { %v916_v16 = vadd.f32 %v914_v12, %v2163_v55 }
 0xcdf   :  { %v954_v13 = vpop.permute.xlu0 %953 }
 0xce0   :  { %v956_v15 = vadd.f32 %v954_v13, %v2148_v40  ;;  %v965_v25 = vpop.permute.xlu1 %964 }
 0xce2   :  { %1880 = vtanh.f32 %v956_v15 }
 0xce3   :  { %1882 = vtanh.f32 %v916_v16 }
 0xce4   :  { %1884 = vpow2.f32 %v1609_v21  ;;  %v925_v35 = vpop.permute.xlu1 %924 }
 0xce5   :  { %v927_v42 = vmul.f32 %v1877_v3, %v925_v35 }
 0xcec   :  { %v1881_v17 = vpop.eup %1880 }
 0xced   :  { %960 = vrot.lane.b32.xlu0 %v1881_v17, %s2015_s4  ;;  %v1883_v19 = vpop.eup %1882 }
 0xcee   :  { %v1885_v22 = vpop.eup %1884 }
 0xcef   :  { %v945_v23 = vadd.f32 1.0, %v1885_v22 }
 0xcf1   :  { %920 = vrot.lane.b32.xlu0 %v1883_v19, %s2015_s4  ;;  %1886 = vrcp.f32 %v945_v23 }
 0xcfb   :  { %v1887_v24 = vpop.eup %1886 }
 0xcfc   :  { %v958_v27 = vsub.f32 1.0, %v1887_v24  ;;  %v967_v32 = vmul.f32 %v1887_v24, %v965_v25 }
 0xd5f   :  { %v961_v29 = vpop.permute.xlu0 %960 }
 0xd60   :  { %v963_v34 = vmul.f32 %v961_v29, %v958_v27 }
 0xd62   :  { %v2303_v38 = vadd.f32 %v967_v32, %v963_v34 }
 0xd63   :  { %v921_v41 = vpop.permute.xlu0 %920 }
 0xd64   :  { %v923_v45 = vmul.f32 %v921_v41, %v918_v39  ;;  %v979_v43 = vrot.slane %v2303_v38, 6 }
 0xd66   :  { %v928_v46 = vadd.f32 %v927_v42, %v923_v45  ;;  %980 = vrot.lane.b32.xlu1 %v979_v43, %s2016_s10 }
 0xd68   :  { %970 = vrot.lane.b32.xlu0 %v928_v46, %s2015_s4 }
 0xdd8   :  { %v981_v47 = vpop.permute.xlu1 %980 }
 0xdda   :  { %v2308_v48 = vpop.permute.xlu0 %970 }
 0xddb   :  { %v983_v49 = vsel %vm329_vm2, %v2308_v48, %v981_v47 }
 0xddc   :  { %1610 = vmatmul.mubr.msk.f32.vlgmr.msra.gmra.mrb[8].mxu0 %vm174_vm3, %v983_v49  ;;  %v1125_v3 = vrot.slane %v983_v49, 4  ;;  %v1084_v5 = vrot.slane %v983_v49, 6 }
 0xddd   :  { %1771 = vmatpush1.bf16.msra.mxu0 %v2083_v8  ;;  %1376 = vmatprep.mubr.f32.mxu0 %v2013_v0 }
 0xdde   :  { %1773 = vmatprep.subr.bf16.mxu0 %v2085_v9 }
 0xde1   :  { %1775 = vmatpush1.bf16.msra.mxu0 %v2089_v14 }
 0xde2   :  { %1777 = vmatprep.subr.bf16.mxu0 %v2101_v18 }
 0xde5   :  { %1779 = vmatpush1.bf16.msra.mxu0 %v2107_v26 }
 0xde6   :  { %1781 = vmatprep.subr.bf16.mxu0 %v2113_v28 }
 0xde9   :  { %1783 = vmatpush1.bf16.msra.mxu0 %v2117_v31 }
 0xeaf   :  { %v1053_v51 = vpop.f32.mrb[8].mxu0 }
 0xeb0   :  { %v1054_v52 = vadd.f32 %v1053_v51, %v2158_v50  ;;  %v1055_v53 = vpop.f32.mrb[9].mxu0 }
 0xeb1   :  { %v1056_v8 = vadd.f32 %v1055_v53, %v2153_v44 }
 0xeb2   :  { %v1059_v54 = vrot.slane %v1054_v52, 6  ;;  %v1090_v9 = vrot.slane %v1054_v52, 4 }
 0xeb3   :  { %v1100_v57 = vrot.slane %v1056_v8, 4 }
 0xeb4   :  { %1068 = vrot.lane.b32.xlu1 %v1059_v54, %s2014_s3  ;;  %v1061_v14 = vadd.f32 %v1059_v54, %v2163_v55  ;;  %v1092_v18 = vadd.f32 %v1090_v9, %v2165_v56 }
 0xeb5   :  { %1109 = vrot.lane.b32.xlu0 %v1100_v57, %s2014_s3  ;;  %v1102_v15 = vadd.f32 %v1100_v57, %v2148_v40 }
 0xeb6   :  { %v1611_v26 = vmul.f32 -1.442695, %v1061_v14  ;;  %v1612_v28 = vmul.f32 -1.442695, %v1092_v18 }
 0xeb7   :  { %v1613_v16 = vmul.f32 -1.442695, %v1102_v15 }
 0xeb8   :  { %1888 = vpow2.f32 %v1611_v26 }
 0xeb9   :  { %1890 = vpow2.f32 %v1612_v28 }
 0xec2   :  { %v1889_v31 = vpop.eup %1888 }
 0xec3   :  { %v1891_v58 = vpop.eup %1890  ;;  %v1065_v59 = vadd.f32 1.0, %v1889_v31 }
 0xec4   :  { %v1096_v60 = vadd.f32 1.0, %v1891_v58 }
 0xec5   :  { %1892 = vrcp.f32 %v1065_v59 }
 0xec6   :  { %1894 = vrcp.f32 %v1096_v60 }
 0xecf   :  { %v1893_v61 = vpop.eup %1892 }
 0xed0   :  { %v1895_v62 = vpop.eup %1894  ;;  %v1078_v32 = vsub.f32 1.0, %v1893_v61 }
 0xf26   :  { %v1069_v4 = vpop.permute.xlu1 %1068 }
 0xf27   :  { %v1071_v63 = vmul.f32 %v1893_v61, %v1069_v4  ;;  %v1110_v1 = vpop.permute.xlu0 %1109 }
 0xf28   :  { %v1112_v2 = vmul.f32 %v1895_v62, %v1110_v1 }
 0xf29   :  { %1073 = vrot.lane.b32.xlu1 %v1071_v63, %s2014_s3 }
 0xf2a   :  { %1114 = vrot.lane.b32.xlu0 %v1112_v2, %s2014_s3 }
 0xf2d   :  { %1126 = vrot.lane.b32.xlu1 %v1125_v3, %s2015_s4 }
 0xf31   :  { %1085 = vrot.lane.b32.xlu1 %v1084_v5, %s2016_s10 }
 0xf9b   :  { %v1074_v6 = vpop.permute.xlu1 %1073 }
 0xf9c   :  { %v1115_v7 = vpop.permute.xlu0 %1114  ;;  %v1076_v11 = vadd.f32 %v1074_v6, %v2163_v55 }
 0xf9d   :  { %v1117_v10 = vadd.f32 %v1115_v7, %v2148_v40 }
 0xf9f   :  { %1896 = vtanh.f32 %v1117_v10  ;;  %v1127_v21 = vpop.permute.xlu1 %1126 }
 0xfa0   :  { %1898 = vtanh.f32 %v1076_v11 }
 0xfa1   :  { %1900 = vpow2.f32 %v1613_v16 }
 0xfa3   :  { %v1086_v27 = vpop.permute.xlu1 %1085 }
 0xfa4   :  { %v1088_v35 = vmul.f32 %v1893_v61, %v1086_v27 }
 0xfa9   :  { %v1897_v12 = vpop.eup %1896 }
 0xfaa   :  { %1121 = vrot.lane.b32.xlu0 %v1897_v12, %s2015_s4  ;;  %v1899_v13 = vpop.eup %1898 }
 0xfab   :  { %v1901_v17 = vpop.eup %1900 }
 0xfac   :  { %v1106_v19 = vadd.f32 1.0, %v1901_v17 }
 0xfae   :  { %1080 = vrot.lane.b32.xlu0 %v1899_v13, %s2015_s4  ;;  %1902 = vrcp.f32 %v1106_v19 }
 0xfb8   :  { %v1903_v20 = vpop.eup %1902 }
 0xfb9   :  { %v1119_v22 = vsub.f32 1.0, %v1903_v20  ;;  %v1129_v24 = vmul.f32 %v1903_v20, %v1127_v21 }
0x101c   :  { %v1122_v23 = vpop.permute.xlu0 %1121 }
0x101d   :  { %v1124_v25 = vmul.f32 %v1122_v23, %v1119_v22 }
0x101f   :  { %v2336_v29 = vadd.f32 %v1129_v24, %v1124_v25 }
0x1020   :  { %v1081_v34 = vpop.permute.xlu0 %1080 }
0x1021   :  { %v1083_v39 = vmul.f32 %v1081_v34, %v1078_v32  ;;  %v1141_v41 = vrot.slane %v2336_v29, 2 }
0x1023   :  { %v1089_v42 = vadd.f32 %v1088_v35, %v1083_v39  ;;  %1142 = vrot.lane.b32.xlu1 %v1141_v41, %s2016_s10 }
0x1025   :  { %1132 = vrot.lane.b32.xlu0 %v1089_v42, %s2015_s4 }
0x1095   :  { %v1143_v45 = vpop.permute.xlu1 %1142 }
0x1097   :  { %v2341_v43 = vpop.permute.xlu0 %1132 }
0x1098   :  { %v1145_v46 = vsel %vm329_vm2, %v2341_v43, %v1143_v45 }
0x1099   :  { %v1147_v47 = vrot.slane %v1145_v46, 2  ;;  %v1247_v2 = vrot.slane %v1145_v46, 6 }
0x109b   :  { %1614 = vmatmul.mubr.msk.f32.vlgmr.msra.gmra.mrb[6].mxu1 %vm174_vm3, %v1147_v47 }
0x109c   :  { %1649 = vmatprep.mubr.msk.f32.mxu1 %vm2018_vm7, %v2013_v0 }
0x116e   :  { %v1216_v49 = vpop.f32.mrb[6].mxu1 }
0x116f   :  { %v1217_v51 = vadd.f32 %v1216_v49, %v2158_v50  ;;  %v1218_v52 = vpop.f32.mrb[7].mxu1 }
0x1170   :  { %v1219_v53 = vadd.f32 %v1218_v52, %v2153_v44 }
0x1171   :  { %v1222_v8 = vrot.slane %v1217_v51, 4  ;;  %v1253_v57 = vrot.slane %v1217_v51, 6 }
0x1172   :  { %v1263_v54 = vrot.slane %v1219_v53, 6 }
0x1173   :  { %1231 = vrot.lane.b32.xlu1 %v1222_v8, %s2014_s3  ;;  %v1224_v9 = vadd.f32 %v1222_v8, %v2163_v55  ;;  %v1255_v14 = vadd.f32 %v1253_v57, %v2165_v56 }
0x1174   :  { %1272 = vrot.lane.b32.xlu0 %v1263_v54, %s2014_s3  ;;  %v1265_v12 = vadd.f32 %v1263_v54, %v2148_v40 }
0x1175   :  { %v1615_v18 = vmul.f32 -1.442695, %v1224_v9  ;;  %v1616_v26 = vmul.f32 -1.442695, %v1255_v14 }
0x1176   :  { %v1617_v13 = vmul.f32 -1.442695, %v1265_v12 }
0x1177   :  { %1904 = vpow2.f32 %v1615_v18 }
0x1178   :  { %1906 = vpow2.f32 %v1616_v26 }
0x1181   :  { %v1905_v28 = vpop.eup %1904 }
0x1182   :  { %v1907_v31 = vpop.eup %1906  ;;  %v1228_v58 = vadd.f32 1.0, %v1905_v28 }
0x1183   :  { %v1259_v59 = vadd.f32 1.0, %v1907_v31 }
0x1184   :  { %1908 = vrcp.f32 %v1228_v58 }
0x1185   :  { %1910 = vrcp.f32 %v1259_v59 }
0x118e   :  { %v1909_v60 = vpop.eup %1908 }
0x118f   :  { %v1911_v4 = vpop.eup %1910  ;;  %v1241_v27 = vsub.f32 1.0, %v1909_v60 }
0x11e5   :  { %v1232_v61 = vpop.permute.xlu1 %1231 }
0x11e6   :  { %v1234_v62 = vmul.f32 %v1909_v60, %v1232_v61  ;;  %v1273_v63 = vpop.permute.xlu0 %1272 }
0x11e7   :  { %v1275_v1 = vmul.f32 %v1911_v4, %v1273_v63 }
0x11e8   :  { %1236 = vrot.lane.b32.xlu1 %v1234_v62, %s2014_s3 }
0x11e9   :  { %1277 = vrot.lane.b32.xlu0 %v1275_v1, %s2014_s3 }
0x11ec   :  { %1288 = vrot.lane.b32.xlu1 %v1145_v46, %s2015_s4 }
0x11f0   :  { %1248 = vrot.lane.b32.xlu1 %v1247_v2, %s2016_s10 }
0x125a   :  { %v1237_v3 = vpop.permute.xlu1 %1236 }
0x125b   :  { %v1278_v5 = vpop.permute.xlu0 %1277  ;;  %v1239_v7 = vadd.f32 %v1237_v3, %v2163_v55 }
0x125c   :  { %v1280_v6 = vadd.f32 %v1278_v5, %v2148_v40  ;;  %v1466_v5 = vld [vmem:[%s2475_s5] sm:$0xff] }
0x125e   :  { %1912 = vtanh.f32 %v1280_v6  ;;  %v1289_v19 = vpop.permute.xlu1 %1288  ;;  %v1467_v6 = vld [vmem:[%s2475_s5 + $0x8] sm:$0xff] }
0x125f   :  { %1914 = vtanh.f32 %v1239_v7  ;;  %v1468_v7 = vld [vmem:[%s2475_s5 + $0x10] sm:$0xff] }
0x1260   :  { %1916 = vpow2.f32 %v1617_v13  ;;  %v1470_v13 = vld [vmem:[%s2475_s5 + $0x20] sm:$0xff] }
0x1262   :  { %v1249_v24 = vpop.permute.xlu1 %1248 }
0x1263   :  { %v1251_v34 = vmul.f32 %v1909_v60, %v1249_v24 }
0x1268   :  { %v1913_v10 = vpop.eup %1912 }
0x1269   :  { %1284 = vrot.lane.b32.xlu0 %v1913_v10, %s2015_s4  ;;  %v1915_v11 = vpop.eup %1914  ;;  %v1785_v10 = vpack.c.bf16 %v1467_v6, %v1466_v5 }
0x126a   :  { %v1917_v15 = vpop.eup %1916 }
0x126b   :  { %v1269_v16 = vadd.f32 1.0, %v1917_v15  ;;  %v1471_v15 = vld [vmem:[%s2475_s5 + $0x28] sm:$0xff] }
0x126d   :  { %1243 = vrot.lane.b32.xlu0 %v1915_v11, %s2015_s4  ;;  %1918 = vrcp.f32 %v1269_v16  ;;  %v1469_v11 = vld [vmem:[%s2475_s5 + $0x18] sm:$0xff]  ;;  %v1791_v16 = vpack.c.bf16 %v1471_v15, %v1470_v13 }
0x126e   :  { %v1788_v12 = vpack.c.bf16 %v1469_v11, %v1468_v7 }
0x1277   :  { %v1919_v17 = vpop.eup %1918 }
0x1278   :  { %v1282_v20 = vsub.f32 1.0, %v1919_v17  ;;  %v1291_v22 = vmul.f32 %v1919_v17, %v1289_v19 }
0x12db   :  { %v1285_v21 = vpop.permute.xlu0 %1284 }
0x12dc   :  { %v1287_v23 = vmul.f32 %v1285_v21, %v1282_v20 }
0x12de   :  { %v2361_v25 = vadd.f32 %v1291_v22, %v1287_v23  ;;  %v1472_v22 = vld [vmem:[%s2475_s5 + $0x30] sm:$0xff]  ;;  %v1473_v23 = vld [vmem:[%s2475_s5 + $0x38] sm:$0xff]  ;;  %s2019_s5 = smov [#allocation5]  }
0x12df   :  { %v1244_v32 = vpop.permute.xlu0 %1243  ;;  %v1794_v24 = vpack.c.bf16 %v1473_v23, %v1472_v22  ;;  %s1563_s26 = sshll.u32 %s2019_s5, 4  ;;  %s1564_s26 = int_to_ptr.vmem [resolvable:$true] %s1563_s26 }
0x12e0   :  { %v1246_v35 = vmul.f32 %v1244_v32, %v1241_v27  ;;  %v1303_v39 = vrot.slane %v2361_v25, 6  ;;  %s1960_s27 = scalar_lea.vmem %s1564_s26, 256  ;;  %p1965_p9 = scmp.lt.s32.totalorder %s1564_s26, %s1564_s26 }
0x12e1   :  { %p1961_p8 = scmp.ne.s32.totalorder %s1564_s26, %s1960_s27  ;;  %p1966_p10 = scmp.lt.s32.totalorder %s1960_s27, %s1960_s27 }
0x12e2   :  { %v1252_v41 = vadd.f32 %v1251_v34, %v1246_v35  ;;  %1304 = vrot.lane.b32.xlu1 %v1303_v39, %s2016_s10 }
0x12e3   :  { %p1967_p11 = por %p1966_p10, %p1965_p9 }
0x12e4   :  { %1294 = vrot.lane.b32.xlu0 %v1252_v41, %s2015_s4 }
0x12e5   :  { %p1968_p12 = pnand %p1967_p11, %p1961_p8 }
0x1354   :  { %v1305_v42 = vpop.permute.xlu1 %1304 }
0x1356   :  { %v2366_v45 = vpop.permute.xlu0 %1294 }
0x1357   :  { %v1307_v46 = vsel %vm329_vm2, %v2366_v45, %v1305_v42 }
0x1358   :  { %v1309_v47 = vrot.slane %v1307_v46, 4 }
0x135a   :  { %1618 = vmatmul.mubr.msk.f32.vlgmr.msra.gmra.mrb[10].mxu0 %vm174_vm3, %v1309_v47 }
0x142d   :  { %v1378_v49 = vpop.f32.mrb[10].mxu0 }
0x142e   :  { %v1379_v51 = vadd.f32 %v1378_v49, %v2158_v50  ;;  %v1380_v52 = vpop.f32.mrb[11].mxu0 }
0x142f   :  { %v1381_v53 = vadd.f32 %v1380_v52, %v2153_v44 }
0x1430   :  { %v1384_v8 = vrot.slane %v1379_v51, 2  ;;  %v1415_v54 = vadd.f32 %v1379_v51, %v2165_v56  ;;  %v1409_v56 = vrot.slane %v1307_v46, 6 }
0x1431   :  { %1430 = vrot.lane.b32.xlu0 %v1381_v53, %s2014_s3  ;;  %v1422_v17 = vadd.f32 %v1381_v53, %v2148_v40 }
0x1432   :  { %1393 = vrot.lane.b32.xlu1 %v1384_v8, %s2014_s3  ;;  %v1386_v57 = vadd.f32 %v1384_v8, %v2163_v55  ;;  %v1620_v9 = vmul.f32 -1.442695, %v1415_v54 }
0x1433   :  { %v1621_v19 = vmul.f32 -1.442695, %v1422_v17 }
0x1434   :  { %v1619_v14 = vmul.f32 -1.442695, %v1386_v57  ;;  %1920 = vpow2.f32 %v1620_v9 }
0x1436   :  { %1922 = vpow2.f32 %v1619_v14 }
0x143e   :  { %v1921_v18 = vpop.eup %1920 }
0x143f   :  { %v1419_v28 = vadd.f32 1.0, %v1921_v18 }
0x1440   :  { %v1923_v26 = vpop.eup %1922 }
0x1441   :  { %v1390_v50 = vadd.f32 1.0, %v1923_v26  ;;  %1924 = vrcp.f32 %v1419_v28 }
0x1443   :  { %1926 = vrcp.f32 %v1390_v50 }
0x144b   :  { %v1925_v44 = vpop.eup %1924 }
0x144d   :  { %v1927_v58 = vpop.eup %1926 }
0x144e   :  { %v1403_v46 = vsub.f32 1.0, %v1927_v58 }
0x14a3   :  { %v1431_v31 = vpop.permute.xlu0 %1430 }
0x14a4   :  { %v1433_v59 = vmul.f32 %v1925_v44, %v1431_v31  ;;  %v1394_v60 = vpop.permute.xlu1 %1393 }
0x14a5   :  { %v1396_v61 = vmul.f32 %v1927_v58, %v1394_v60 }
0x14a6   :  { %1435 = vrot.lane.b32.xlu0 %v1433_v59, %s2014_s3 }
0x14a7   :  { %1398 = vrot.lane.b32.xlu1 %v1396_v61, %s2014_s3 }
0x14ab   :  { %1446 = vrot.lane.b32.xlu1 %v1309_v47, %s2015_s4 }
0x14af   :  { %1410 = vrot.lane.b32.xlu1 %v1409_v56, %s2016_s10 }
0x1518   :  { %v1436_v4 = vpop.permute.xlu0 %1435 }
0x1519   :  { %v1438_v62 = vadd.f32 %v1436_v4, %v2148_v40  ;;  %v1399_v63 = vpop.permute.xlu1 %1398 }
0x151a   :  { %v1401_v1 = vadd.f32 %v1399_v63, %v2163_v55  ;;  %v2017_v55 = vmov 0.0|0.0  }
0x151b   :  { %1928 = vtanh.f32 %v1438_v62  ;;  %1784 = vmatprep.subr.bf16.mxu1 %v2017_v55 }
0x151c   :  { %1930 = vtanh.f32 %v1401_v1  ;;  %1786 = vmatpush3.bf16.msra.mxu1 %v1785_v10 }
0x151d   :  { %1787 = vmatprep.subr.bf16.mxu1 %v2017_v55  ;;  %1932 = vpow2.f32 %v1621_v19  ;;  %v1447_v32 = vpop.permute.xlu1 %1446 }
0x1520   :  { %1789 = vmatpush3.bf16.msra.mxu1 %v1788_v12 }
0x1521   :  { %1790 = vmatprep.subr.bf16.mxu1 %v2017_v55  ;;  %v1411_v41 = vpop.permute.xlu1 %1410 }
0x1522   :  { %v1413_v49 = vmul.f32 %v1927_v58, %v1411_v41 }
0x1524   :  { %1792 = vmatpush3.bf16.msra.mxu1 %v1791_v16 }
0x1525   :  { %v1929_v2 = vpop.eup %1928  ;;  %1793 = vmatprep.subr.bf16.mxu1 %v2017_v55 }
0x1526   :  { %1442 = vrot.lane.b32.xlu0 %v1929_v2, %s2015_s4  ;;  %v1931_v3 = vpop.eup %1930 }
0x1527   :  { %v1933_v20 = vpop.eup %1932 }
0x1528   :  { %v1426_v21 = vadd.f32 1.0, %v1933_v20  ;;  %1795 = vmatpush3.bf16.msra.mxu1 %v1794_v24 }
0x152a   :  { %1405 = vrot.lane.b32.xlu0 %v1931_v3, %s2015_s4  ;;  %1934 = vrcp.f32 %v1426_v21 }
0x1534   :  { %v1935_v27 = vpop.eup %1934 }
0x1535   :  { %v1440_v34 = vsub.f32 1.0, %v1935_v27  ;;  %v1449_v35 = vmul.f32 %v1935_v27, %v1447_v32 }
0x1598   :  { %v1443_v40 = vpop.permute.xlu0 %1442 }
0x1599   :  { %v1445_v39 = vmul.f32 %v1443_v40, %v1440_v34 }
0x159b   :  { %v1450_v42 = vadd.f32 %v1449_v35, %v1445_v39 }
0x159c   :  { %v1406_v47 = vpop.permute.xlu0 %1405 }
0x159d   :  { %v1408_v51 = vmul.f32 %v1406_v47, %v1403_v46  ;;  %v1461_v52 = vrot.slane %v1450_v42, 2 }
0x159f   :  { %v1414_v53 = vadd.f32 %v1413_v49, %v1408_v51  ;;  %1462 = vrot.lane.b32.xlu1 %v1461_v52, %s2016_s10 }
0x15a1   :  { %1452 = vrot.lane.b32.xlu0 %v1414_v53, %s2015_s4 }
0x15a3   :  { %486 = vrot.lane.b32.xlu1 %v2208_v33, %s2016_s10 }
0x15a5   :  { %319 = vrot.lane.b32.xlu0 %v2176_v30, %s2016_s10 }
0x15a7   :  { %814 = vrot.lane.b32.xlu1 %v2272_v37, %s2016_s10 }
0x15a9   :  { %652 = vrot.lane.b32.xlu0 %v2240_v36, %s2016_s10 }
0x15ab   :  { %1137 = vrot.lane.b32.xlu1 %v2336_v29, %s2016_s10 }
0x15ad   :  { %975 = vrot.lane.b32.xlu0 %v2303_v38, %s2016_s10 }
0x15af   :  { %1457 = vrot.lane.b32.xlu1 %v1450_v42, %s2016_s10 }
0x15b1   :  { %1299 = vrot.lane.b32.xlu0 %v2361_v25, %s2016_s10 }
0x1611   :  { %v1463_v0 = vpop.permute.xlu1 %1462 }
0x1613   :  { %v1453_v33 = vpop.permute.xlu0 %1452 }
0x1614   :  { %v1465_v30 = vsel %vm329_vm2, %v1453_v33, %v1463_v0 }
0x1615   :  { %v1482_v37 = vrot.slane %v1465_v30, 6  ;;  %v487_v8 = vpop.permute.xlu1 %486 }
0x1616   :  { %491 = vst.msk [vmem:[#allocation5 + $0x8] sm:$0x30] %vm490_vm8, %v487_v8 }
0x1617   :  { %1297 = vst.msk [vmem:[#allocation5 + $0x8] sm:$0x30] %vm649_vm5, %v2366_v45  ;;  %v320_v36 = vpop.permute.xlu0 %319  ;;  %1650 = vmatmul.mubr.msk.f32.vlgmr.msra.gmra.mrb[8].mxu1 %vm174_vm3, %v1482_v37 }
0x1618   :  { %324 = vst.msk [vmem:[#allocation5 + $0x8] sm:$0xc0] %vm323_vm9, %v320_v36 }
0x1619   :  { %1455 = vst.msk [vmem:[#allocation5 + $0x8] sm:$0xc0] %vm811_vm6, %v1453_v33  ;;  %v815_v38 = vpop.permute.xlu1 %814 }
0x161a   :  { %819 = vst.msk [vmem:[#allocation5 + $0x8] sm:$0x3] %vm818_vm10, %v815_v38 }
0x161b   :  { %973 = vst.msk [vmem:[#allocation5 + $0x8] sm:$0x3] %vm316_vm1, %v2308_v48  ;;  %v653_v29 = vpop.permute.xlu0 %652 }
0x161c   :  { %657 = vst.msk [vmem:[#allocation5 + $0x8] sm:$0xc] %vm656_vm11, %v653_v29 }
0x161d   :  { %1135 = vst.msk [vmem:[#allocation5 + $0x8] sm:$0xc] %vm483_vm4, %v2341_v43  ;;  %v1138_v25 = vpop.permute.xlu1 %1137 }
0x161e   :  { %1140 = vst.msk [vmem:[#allocation5] sm:$0x30] %vm490_vm8, %v1138_v25 }
0x161f   :  { %v976_v45 = vpop.permute.xlu0 %975 }
0x1620   :  { %978 = vst.msk [vmem:[#allocation5] sm:$0xc0] %vm323_vm9, %v976_v45 }
0x1621   :  { %v1458_v54 = vpop.permute.xlu1 %1457 }
0x1622   :  { %1460 = vst.msk [vmem:[#allocation5] sm:$0x3] %vm818_vm10, %v1458_v54 }
0x1623   :  { %v1300_v57 = vpop.permute.xlu0 %1299 }
0x1624   :  { %1302 = vst.msk [vmem:[#allocation5] sm:$0xc] %vm656_vm11, %v1300_v57 }
0x1625   :  { %1971 = shalt.err (!%p1968_p12)
}
0x1626   :  { %s1972_s0 = scalar_lea.hbm %s2477_s7, 256 }
0x1627   :  { %p1973_p13 = scmp.ne.s32.totalorder %s2477_s7, %s1972_s0  ;;  %p1976_p0 = scmp.lt.u32.totalorder %s1972_s0, %s2477_s7 }
0x1629   :  { %p1978_p1 = pnand %p1976_p0, %p1973_p13 }
0x162b   :  { %1981 = shalt.err (!%p1978_p1)
}
0x162c   :  { %s2020_s4 = smov 2   ;;  %v1622_v48 = vld [vmem:[%s2476_s6] ss:$0 sm:$0xff]  ;;  %s2021_s15 = smov [#allocation6]   ;;  %vm1556_vm12 = vcmask 189440  }
0x162d   :  { %1569 = dma.vmem_to_hbm [thread:$0]  %s1564_s26, 256, %s2477_s7, [#allocation4], %s2016_s10, %s2016_s10, %s2020_s4  }
0x162e   :  { %s1576_s16 = sshll.u32 %s2021_s15, 4  ;;  %s1577_s16 = int_to_ptr.vmem [resolvable:$true] %s1576_s16 }
0x162f   :  { %s1982_s17 = scalar_lea.vmem %s1577_s16, 32  ;;  %p1987_p3 = scmp.lt.s32.totalorder %s1577_s16, %s1577_s16 }
0x1630   :  { %p1983_p2 = scmp.ne.s32.totalorder %s1577_s16, %s1982_s17  ;;  %p1988_p4 = scmp.lt.s32.totalorder %s1982_s17, %s1982_s17 }
0x1632   :  { %p1989_p5 = por %p1988_p4, %p1987_p3 }
0x1634   :  { %p1990_p6 = pnand %p1989_p5, %p1983_p2 }
0x16ea   :  { %v1551_v43 = vpop.f32.mrb[8].mxu1 }
0x16eb   :  { %v1552_v9 = vadd.f32 %v1622_v48, %v1551_v43  ;;  %v1651_v14 = vpop.f32.mrb[9].mxu1 }
0x16ed   :  { %1936 = vtanh.f32 %v1552_v9 }
0x16f7   :  { %v1937_v18 = vpop.eup %1936 }
0x16f8   :  { %1557 = vst.msk [vmem:[#allocation6] sm:$0x3] %vm1556_vm12, %v1937_v18 }
0x16f9   :  { %1993 = shalt.err (!%p1990_p6)
}
0x16fa   :  { %s1994_s6 = scalar_lea.hbm %s2478_s8, 32 }
0x16fb   :  { %p1995_p7 = scmp.ne.s32.totalorder %s2478_s8, %s1994_s6  ;;  %p1998_p8 = scmp.lt.u32.totalorder %s1994_s6, %s2478_s8 }
0x16fd   :  { %p2000_p9 = pnand %p1998_p8, %p1995_p7 }
0x16ff   :  { %2003 = shalt.err (!%p2000_p9)
}
0x1700   :  { %1579 = dma.vmem_to_hbm [thread:$0]  %s1577_s16, 32, %s2478_s8, [#allocation7]  }
0x1701   :  { %2006 = dma.done.wait [#allocation4], 256  }
0x1702   :  { %2007 = vsyncadd [#allocation4], 4294967040 }
0x1703   :  { %2008 = dma.done.wait [#allocation7], 32  }
0x1704   :  { %2009 = vsyncadd [#allocation7], 4294967264 }
0x1705   :  { %1586 = vsyncpa [#allocation3], 1 }
0x1706   :  { %1587 = vsyncpa [#allocation4], 1 }
0x1707   :  { %1588 = vsyncpa [#allocation7], 1 }

</bundles_post_ra>
